<compile_context>
chip_gen: v6e
topology: v6e:2x2x1
jax: 0.10.0
libtpu: 0.0.40
codegen_flags: <defaults>
</compile_context>

<pallas_src>
import functools
import math

import jax
import jax.numpy as jnp
from jax import lax
from jax.experimental import pallas as pl
from jax.experimental.pallas import tpu as pltpu


def _round_up(x, m):
    return ((x + m - 1) // m) * m


def _pick_t_tile(t_out, v, target_rows=2048):
    """Largest divisor d of t_out with d*v a multiple of 16 (bf16) and <= target_rows."""
    for row_mult in (16, 8):
        best = None
        for d in range(1, t_out + 1):
            if t_out % d == 0 and (d * v) % row_mult == 0 and d * v <= target_rows:
                best = d
        if best is not None:
            return best
    return t_out  # single tile (full dim) — VMEM guard below will catch blowups


def _pick_rows(total, cap=8192, mult=8):
    """Row-block size for the memory-bound normalise pass: fat but VMEM-friendly."""
    if total <= cap:
        return total
    best = None
    for d in range(1, cap + 1):
        if total % d == 0 and d % mult == 0:
            best = d
    return best if best is not None else total


def _vb(rows, itemsize, lanes=128):
    """Rough VMEM bytes for a (rows, lanes) tile (lanes pad to 128, rows to 16)."""
    return _round_up(max(rows, 1), 16) * _round_up(max(lanes, 1), 128) * itemsize


def _conv_stats_kernel(x_ref, w_ref, y_ref, stats_ref, xcol_ref, *,
                       K, stride, t_tile, V, C_in, D):
    # stride == 1:
    #   x_ref : (1, T_pad*V, C_in)        full flattened (time*vertex) axis, one batch
    # stride  > 1:
    #   x_ref : (1, T_fold//stride, stride*V, C_in)   stride-folded time axis
    # w_ref    : (D, C_out_p)             packed im2col weights (tap-major rows)
    # y_ref    : (1, t_tile*V, C_out_p)   conv output tile (bf16, lane-dense)
    # stats_ref: (1, 1, 2, C_out_p)       per-tile BN partials [mean; M2] (f32)
    # xcol_ref : VMEM scratch (t_tile*V, D) bf16 — packed im2col staging buffer
    t = pl.program_id(1)
    row0 = t * t_tile
    M = t_tile * V
    KC = K * C_in

    # Zero the padded contraction columns every step (scratch is uninitialised and
    # may be re-sharded across cores; this is a single masked store pass, cheap).
    if D > KC:
        xcol_ref[:, KC:] = jnp.zeros((M, D - KC), xcol_ref.dtype)

    # Stage the K taps back-to-back (packed: tap k occupies columns [k*C_in, (k+1)*C_in)).
    for k in range(K):
        if stride == 1:
            start = pl.multiple_of((row0 + k) * V, V)
            xs = x_ref[0, pl.ds(start, M), :]                      # (M, C_in)
        else:
            q, r = k // stride, k % stride
            xs = x_ref[0, pl.ds(row0 + q, t_tile), pl.ds(r * V, V), :]
            xs = xs.reshape(M, C_in)
        xcol_ref[:, k * C_in:(k + 1) * C_in] = xs

    # One contraction-dense bf16 MXU matmul, f32 accumulate.
    y = jnp.dot(xcol_ref[...], w_ref[...], preferred_element_type=jnp.float32)

    # Fused BN partial statistics (shifted by the tile mean for numerical safety),
    # computed from the f32 accumulator before the bf16 store.
    mu = jnp.sum(y, axis=0, keepdims=True) * (1.0 / M)             # (1, C_out_p)
    d = y - mu
    m2 = jnp.sum(d * d, axis=0, keepdims=True)                     # (1, C_out_p)

    y_ref[0] = y.astype(y_ref.dtype)
    stats_ref[0, 0] = jnp.concatenate([mu, m2], axis=0)            # (2, C_out_p)


def _bn_apply_kernel(y_ref, scale_ref, shift_ref, o_ref, *, C_out):
    # y_ref : (1, rows2, C_out_p) bf16 ; scale/shift: (1, C_out) f32
    # o_ref : (1, rows2, C_out)   — channel un-pad folded into the out_spec.
    yb = y_ref[0][:, :C_out].astype(jnp.float32)
    o_ref[0] = (yb * scale_ref[...] + shift_ref[...]).astype(o_ref.dtype)


def tcn_forward(x_nchw, weight, bias, gamma, beta, *, kernel_size=9, stride=1,
                eps=1e-5, t_tile=None, compute_dtype=jnp.bfloat16):
    """x_nchw: (N, C_in, T, V); weight: (C_out, C_in, K, 1); bias/gamma/beta: (C_out,).

    `bias` is accepted for API parity but is mathematically a no-op here: the
    training-mode BatchNorm subtracts the batch mean, so a per-channel conv bias
    cancels exactly in the returned tensor.
    """
    del bias  # cancels under training-mode BN (see docstring)

    N, C_in, T, V = x_nchw.shape
    C_out = weight.shape[0]
    K = kernel_size
    pad = (K - 1) // 2
    T_pad = T + 2 * pad
    T_out = (T_pad - K) // stride + 1

    C_out_p = _round_up(C_out, 128)
    D = _round_up(K * C_in, 128)            # packed im2col contraction depth

    if t_tile is None:
        t_tile = _pick_t_tile(T_out, V)
    if T_out % t_tile != 0:
        raise ValueError("t_tile must divide T_out")
    num_t = T_out // t_tile
    tile_rows = t_tile * V
    if num_t > 1 and tile_rows % 8 != 0:
        raise ValueError("t_tile*V must be a multiple of 8 (or use a single tile)")

    # ---- glue (plain JAX): channels-last, temporal pad, bf16 cast, stride handling ----
    x = jnp.transpose(x_nchw, (0, 2, 3, 1)).astype(compute_dtype)          # (N,T,V,C_in)
    if stride == 1:
        x = jnp.pad(x, ((0, 0), (pad, pad), (0, 0), (0, 0)))
        x_in = x.reshape(N, T_pad * V, C_in)                               # rows already flat
        in_block = (1, T_pad * V, C_in)
        in_map = lambda n, t: (n, 0, 0)
        in_rows = T_pad * V
    else:
        T_fold = _round_up(T_pad, stride)
        T1 = T_fold // stride
        x = jnp.pad(x, ((0, 0), (pad, T_fold - T - pad), (0, 0), (0, 0)))
        # Fold the temporal stride into the vertex axis: (n, t1, r*V+v, c) == time t1*stride+r.
        x_in = x.reshape(N, T1, stride * V, C_in)
        in_block = (1, T1, stride * V, C_in)
        in_map = lambda n, t: (n, 0, 0, 0)
        in_rows = T1 * stride * V

    # weight (C_out, C_in, K, 1) -> (D, C_out_p), tap-major packed rows (matches im2col).
    w = jnp.transpose(weight[..., 0], (2, 1, 0)).reshape(K * C_in, C_out)  # (K*C_in, C_out)
    w2 = jnp.pad(w, ((0, D - K * C_in), (0, C_out_p - C_out))).astype(compute_dtype)

    # ---- pass-1 VMEM budget (double-buffered blocks) + guard ----
    est1 = (2 * _vb(in_rows, 2)                    # input block (lanes pad to 128)
            + 2 * _vb(D, 2, C_out_p)               # packed weights
            + _vb(tile_rows, 2, D)                 # xcol scratch
            + 2 * _vb(tile_rows, 2, C_out_p)       # y output block
            + 2 * _vb(16, 4, C_out_p)              # stats block
            + (2 << 20))                           # slack for compiler temporaries
    if est1 > 56 * (1 << 20):
        raise ValueError(
            "pass-1 VMEM estimate %.1f MiB too large; reduce t_tile or halo-tile "
            "the time axis for very long sequences" % (est1 / (1 << 20)))
    vmem1 = int(min(64 * (1 << 20), max(32 * (1 << 20), int(est1 * 1.5))))

    # ---- pass 1: conv (+ fused BN partial stats), tiled over (batch, T_out) ----
    y, stats = pl.pallas_call(
        functools.partial(_conv_stats_kernel, K=K, stride=stride, t_tile=t_tile,
                          V=V, C_in=C_in, D=D),
        grid=(N, num_t),
        in_specs=[
            pl.BlockSpec(in_block, in_map),
            pl.BlockSpec((D, C_out_p), lambda n, t: (0, 0)),
        ],
        out_specs=[
            pl.BlockSpec((1, tile_rows, C_out_p), lambda n, t: (n, t, 0)),
            pl.BlockSpec((1, 1, 2, C_out_p), lambda n, t: (n, t, 0, 0)),
        ],
        out_shape=[
            jax.ShapeDtypeStruct((N, T_out * V, C_out_p), compute_dtype),
            jax.ShapeDtypeStruct((N, num_t, 2, C_out_p), jnp.float32),
        ],
        scratch_shapes=[pltpu.VMEM((tile_rows, D), compute_dtype)],
        compiler_params=pltpu.CompilerParams(
            dimension_semantics=("parallel", "parallel"),
            vmem_limit_bytes=vmem1),
    )(x_in, w2)

    # ---- combine per-tile stats (tiny, plain JAX): Chan parallel-variance formula ----
    mu_t = stats[:, :, 0, :C_out]                              # (N, num_t, C_out)
    m2_t = stats[:, :, 1, :C_out]
    count = N * T_out * V
    mean = jnp.mean(mu_t, axis=(0, 1))                         # equal counts per tile
    var = (jnp.sum(m2_t, axis=(0, 1))
           + tile_rows * jnp.sum((mu_t - mean) ** 2, axis=(0, 1))) / count
    scale = (gamma * lax.rsqrt(var + eps)).astype(jnp.float32)
    shift = (beta - mean * scale).astype(jnp.float32)
    scale2 = scale.reshape(1, C_out)
    shift2 = shift.reshape(1, C_out)

    # ---- pass 2: fat-tiled, parallel normalize (y * scale + shift), narrow C_out out ----
    R_out = T_out * V
    rows2 = _pick_rows(R_out)
    num_r = R_out // rows2
    out_dtype = x_nchw.dtype

    est2 = (2 * _vb(rows2, 2, C_out_p) + 2 * _vb(rows2, 4, C_out)
            + 4 * _vb(1, 4, C_out) + (2 << 20))
    if est2 > 56 * (1 << 20):
        raise ValueError("pass-2 VMEM estimate too large; reduce the row tile")
    vmem2 = int(min(64 * (1 << 20), max(32 * (1 << 20), int(est2 * 1.5))))

    # Alias y into the output when layout/dtype match (footprint saving only).
    alias = {0: 0} if (out_dtype == y.dtype and C_out == C_out_p) else {}

    out = pl.pallas_call(
        functools.partial(_bn_apply_kernel, C_out=C_out),
        grid=(N, num_r),
        in_specs=[
            pl.BlockSpec((1, rows2, C_out_p), lambda n, r: (n, r, 0)),
            pl.BlockSpec((1, C_out), lambda n, r: (0, 0)),
            pl.BlockSpec((1, C_out), lambda n, r: (0, 0)),
        ],
        out_specs=pl.BlockSpec((1, rows2, C_out), lambda n, r: (n, r, 0)),
        out_shape=jax.ShapeDtypeStruct((N, R_out, C_out), out_dtype),
        input_output_aliases=alias,
        compiler_params=pltpu.CompilerParams(
            dimension_semantics=("parallel", "parallel"),
            vmem_limit_bytes=vmem2),
    )(y, scale2, shift2)

    # ---- back to NCHW (interface requirement; keep channels-last in-model if possible) ----
    out = out.reshape(N, T_out, V, C_out)
    return jnp.transpose(out, (0, 3, 1, 2))


def _reference_forward(x_nchw, weight, bias, gamma, beta, *, kernel_size=9,
                       stride=1, eps=1e-5):
    """Plain-JAX reference matching PyTorch tcn.forward (training-mode BN)."""
    pad = (kernel_size - 1) // 2
    y = lax.conv_general_dilated(
        x_nchw, weight, window_strides=(stride, 1),
        padding=((pad, pad), (0, 0)),
        dimension_numbers=("NCHW", "OIHW", "NCHW"))
    y = y + bias.reshape(1, -1, 1, 1)
    mean = jnp.mean(y, axis=(0, 2, 3), keepdims=True)
    var = jnp.mean((y - mean) ** 2, axis=(0, 2, 3), keepdims=True)
    return ((y - mean) * lax.rsqrt(var + eps) * gamma.reshape(1, -1, 1, 1)
            + beta.reshape(1, -1, 1, 1))


if __name__ == "__main__":
    # Small shapes consistent with the module: NCHW = (batch, channels, T, V).
    N, C_in, C_out, T, V = 2, 4, 8, 16, 16
    K = 9

    key = jax.random.PRNGKey(0)
    kx, kw, kb = jax.random.split(key, 3)

    x = jax.random.normal(kx, (N, C_in, T, V), dtype=jnp.float32)

    # conv_init: kaiming_normal(mode='fan_out') => std = sqrt(2 / (C_out*K*1)), bias = 0.
    # We use a NONZERO bias here to verify the bias-cancellation optimization is exact.
    fan_out = C_out * K * 1
    std = math.sqrt(2.0 / fan_out)
    weight = jax.random.normal(kw, (C_out, C_in, K, 1), dtype=jnp.float32) * std
    bias = 0.1 * jax.random.normal(kb, (C_out,), dtype=jnp.float32)
    gamma = jnp.ones((C_out,), dtype=jnp.float32)   # bn_init(bn, 1)
    beta = jnp.zeros((C_out,), dtype=jnp.float32)

    # Reference with bf16-quantised conv inputs (matches the kernel's compute dtype);
    # the remaining delta is the bf16 storage of the conv intermediate (~1e-2).
    xq = x.astype(jnp.bfloat16).astype(jnp.float32)
    wq = weight.astype(jnp.bfloat16).astype(jnp.float32)

    # Exercise stride=1 (default) and stride>1, each with multiple T tiles.
    for stride, t_tile in ((1, 8), (2, 4)):
        pad = (K - 1) // 2
        T_out = (T + 2 * pad - K) // stride + 1

        out = tcn_forward(x, weight, bias, gamma, beta,
                          kernel_size=K, stride=stride, t_tile=t_tile)
        out = jax.block_until_ready(out)

        ref = _reference_forward(xq, wq, bias, gamma, beta,
                                 kernel_size=K, stride=stride)
        assert out.shape == (N, C_out, T_out, V), (stride, out.shape)
        err = float(jnp.max(jnp.abs(out - ref)))
        assert err < 3e-2, (stride, err)

    print("KERNEL_OK")
</pallas_src>

<mosaic_0001>
module attributes {stable_mosaic.version = 11 : i64} {
  func.func @_conv_stats_kernel(%arg0: i32, %arg1: i32, %arg2: memref<1x384x4xbf16, #tpu.memory_space<vmem>>, %arg3: memref<128x128xbf16, #tpu.memory_space<vmem>>, %arg4: memref<1x128x128xbf16, #tpu.memory_space<vmem>>, %arg5: memref<1x1x2x128xf32, #tpu.memory_space<vmem>>, %arg6: memref<128x128xbf16, #tpu.memory_space<vmem>>) attributes {dimension_semantics = [#tpu.dimension_semantics<parallel>, #tpu.dimension_semantics<parallel>], iteration_bounds = array<i64: 2, 2>, scalar_prefetch = 0 : i64, scratch_operands = 1 : i64, tpu.core_type = #tpu.core_type<tc>, window_params = [{transform_indices = @transform_0, window_bounds = array<i64: 1, 384, 4>}, {pipeline_mode = #tpu.pipeline_mode<synchronous>, transform_indices = @transform_1, window_bounds = array<i64: 128, 128>}, {transform_indices = @transform_2, window_bounds = array<i64: 1, 128, 128>}, {transform_indices = @transform_3, window_bounds = array<i64: 1, 1, 2, 128>}]} {
    %c8_i32 = arith.constant 8 : i32
    %0 = arith.muli %arg1, %c8_i32 : i32
    %cst = arith.constant 0.000000e+00 : bf16
    %1 = vector.broadcast %cst : bf16 to vector<128x92xbf16>
    %c0 = arith.constant 0 : index
    %c36 = arith.constant 36 : index
    %2 = vector.load %arg6[%c0, %c36] : memref<128x128xbf16, #tpu.memory_space<vmem>>, vector<128x92xbf16>
    tpu.vector_store %arg6[%c0, %c36], %1 {strides = array<i32>} : memref<128x128xbf16, #tpu.memory_space<vmem>>, vector<128x92xbf16>,
    %c0_i32 = arith.constant 0 : i32
    %3 = arith.addi %0, %c0_i32 : i32
    %c16_i32 = arith.constant 16 : i32
    %4 = arith.muli %3, %c16_i32 : i32
    %5 = tpu.assume_multiple %4, 16 : i32
    %c0_0 = arith.constant 0 : index
    %6 = arith.index_cast %5 : i32 to index
    %c0_1 = arith.constant 0 : index
    %7 = vector.load %arg2[%c0_0, %6, %c0_1] : memref<1x384x4xbf16, #tpu.memory_space<vmem>>, vector<1x128x4xbf16>
    %8 = vector.shape_cast %7 : vector<1x128x4xbf16> to vector<128x4xbf16>
    %c0_2 = arith.constant 0 : index
    %c0_3 = arith.constant 0 : index
    %9 = vector.load %arg6[%c0_2, %c0_3] : memref<128x128xbf16, #tpu.memory_space<vmem>>, vector<128x4xbf16>
    tpu.vector_store %arg6[%c0_2, %c0_3], %8 {strides = array<i32>} : memref<128x128xbf16, #tpu.memory_space<vmem>>, vector<128x4xbf16>,
    %c1_i32 = arith.constant 1 : i32
    %10 = arith.addi %0, %c1_i32 : i32
    %c16_i32_4 = arith.constant 16 : i32
    %11 = arith.muli %10, %c16_i32_4 : i32
    %12 = tpu.assume_multiple %11, 16 : i32
    %c0_5 = arith.constant 0 : index
    %13 = arith.index_cast %12 : i32 to index
    %c0_6 = arith.constant 0 : index
    %14 = vector.load %arg2[%c0_5, %13, %c0_6] : memref<1x384x4xbf16, #tpu.memory_space<vmem>>, vector<1x128x4xbf16>
    %15 = vector.shape_cast %14 : vector<1x128x4xbf16> to vector<128x4xbf16>
    %c0_7 = arith.constant 0 : index
    %c4 = arith.constant 4 : index
    %16 = vector.load %arg6[%c0_7, %c4] : memref<128x128xbf16, #tpu.memory_space<vmem>>, vector<128x4xbf16>
    tpu.vector_store %arg6[%c0_7, %c4], %15 {strides = array<i32>} : memref<128x128xbf16, #tpu.memory_space<vmem>>, vector<128x4xbf16>,
    %c2_i32 = arith.constant 2 : i32
    %17 = arith.addi %0, %c2_i32 : i32
    %c16_i32_8 = arith.constant 16 : i32
    %18 = arith.muli %17, %c16_i32_8 : i32
    %19 = tpu.assume_multiple %18, 16 : i32
    %c0_9 = arith.constant 0 : index
    %20 = arith.index_cast %19 : i32 to index
    %c0_10 = arith.constant 0 : index
    %21 = vector.load %arg2[%c0_9, %20, %c0_10] : memref<1x384x4xbf16, #tpu.memory_space<vmem>>, vector<1x128x4xbf16>
    %22 = vector.shape_cast %21 : vector<1x128x4xbf16> to vector<128x4xbf16>
    %c0_11 = arith.constant 0 : index
    %c8 = arith.constant 8 : index
    %23 = vector.load %arg6[%c0_11, %c8] : memref<128x128xbf16, #tpu.memory_space<vmem>>, vector<128x4xbf16>
    tpu.vector_store %arg6[%c0_11, %c8], %22 {strides = array<i32>} : memref<128x128xbf16, #tpu.memory_space<vmem>>, vector<128x4xbf16>,
    %c3_i32 = arith.constant 3 : i32
    %24 = arith.addi %0, %c3_i32 : i32
    %c16_i32_12 = arith.constant 16 : i32
    %25 = arith.muli %24, %c16_i32_12 : i32
    %26 = tpu.assume_multiple %25, 16 : i32
    %c0_13 = arith.constant 0 : index
    %27 = arith.index_cast %26 : i32 to index
    %c0_14 = arith.constant 0 : index
    %28 = vector.load %arg2[%c0_13, %27, %c0_14] : memref<1x384x4xbf16, #tpu.memory_space<vmem>>, vector<1x128x4xbf16>
    %29 = vector.shape_cast %28 : vector<1x128x4xbf16> to vector<128x4xbf16>
    %c0_15 = arith.constant 0 : index
    %c12 = arith.constant 12 : index
    %30 = vector.load %arg6[%c0_15, %c12] : memref<128x128xbf16, #tpu.memory_space<vmem>>, vector<128x4xbf16>
    tpu.vector_store %arg6[%c0_15, %c12], %29 {strides = array<i32>} : memref<128x128xbf16, #tpu.memory_space<vmem>>, vector<128x4xbf16>,
    %c4_i32 = arith.constant 4 : i32
    %31 = arith.addi %0, %c4_i32 : i32
    %c16_i32_16 = arith.constant 16 : i32
    %32 = arith.muli %31, %c16_i32_16 : i32
    %33 = tpu.assume_multiple %32, 16 : i32
    %c0_17 = arith.constant 0 : index
    %34 = arith.index_cast %33 : i32 to index
    %c0_18 = arith.constant 0 : index
    %35 = vector.load %arg2[%c0_17, %34, %c0_18] : memref<1x384x4xbf16, #tpu.memory_space<vmem>>, vector<1x128x4xbf16>
    %36 = vector.shape_cast %35 : vector<1x128x4xbf16> to vector<128x4xbf16>
    %c0_19 = arith.constant 0 : index
    %c16 = arith.constant 16 : index
    %37 = vector.load %arg6[%c0_19, %c16] : memref<128x128xbf16, #tpu.memory_space<vmem>>, vector<128x4xbf16>
    tpu.vector_store %arg6[%c0_19, %c16], %36 {strides = array<i32>} : memref<128x128xbf16, #tpu.memory_space<vmem>>, vector<128x4xbf16>,
    %c5_i32 = arith.constant 5 : i32
    %38 = arith.addi %0, %c5_i32 : i32
    %c16_i32_20 = arith.constant 16 : i32
    %39 = arith.muli %38, %c16_i32_20 : i32
    %40 = tpu.assume_multiple %39, 16 : i32
    %c0_21 = arith.constant 0 : index
    %41 = arith.index_cast %40 : i32 to index
    %c0_22 = arith.constant 0 : index
    %42 = vector.load %arg2[%c0_21, %41, %c0_22] : memref<1x384x4xbf16, #tpu.memory_space<vmem>>, vector<1x128x4xbf16>
    %43 = vector.shape_cast %42 : vector<1x128x4xbf16> to vector<128x4xbf16>
    %c0_23 = arith.constant 0 : index
    %c20 = arith.constant 20 : index
    %44 = vector.load %arg6[%c0_23, %c20] : memref<128x128xbf16, #tpu.memory_space<vmem>>, vector<128x4xbf16>
    tpu.vector_store %arg6[%c0_23, %c20], %43 {strides = array<i32>} : memref<128x128xbf16, #tpu.memory_space<vmem>>, vector<128x4xbf16>,
    %c6_i32 = arith.constant 6 : i32
    %45 = arith.addi %0, %c6_i32 : i32
    %c16_i32_24 = arith.constant 16 : i32
    %46 = arith.muli %45, %c16_i32_24 : i32
    %47 = tpu.assume_multiple %46, 16 : i32
    %c0_25 = arith.constant 0 : index
    %48 = arith.index_cast %47 : i32 to index
    %c0_26 = arith.constant 0 : index
    %49 = vector.load %arg2[%c0_25, %48, %c0_26] : memref<1x384x4xbf16, #tpu.memory_space<vmem>>, vector<1x128x4xbf16>
    %50 = vector.shape_cast %49 : vector<1x128x4xbf16> to vector<128x4xbf16>
    %c0_27 = arith.constant 0 : index
    %c24 = arith.constant 24 : index
    %51 = vector.load %arg6[%c0_27, %c24] : memref<128x128xbf16, #tpu.memory_space<vmem>>, vector<128x4xbf16>
    tpu.vector_store %arg6[%c0_27, %c24], %50 {strides = array<i32>} : memref<128x128xbf16, #tpu.memory_space<vmem>>, vector<128x4xbf16>,
    %c7_i32 = arith.constant 7 : i32
    %52 = arith.addi %0, %c7_i32 : i32
    %c16_i32_28 = arith.constant 16 : i32
    %53 = arith.muli %52, %c16_i32_28 : i32
    %54 = tpu.assume_multiple %53, 16 : i32
    %c0_29 = arith.constant 0 : index
    %55 = arith.index_cast %54 : i32 to index
    %c0_30 = arith.constant 0 : index
    %56 = vector.load %arg2[%c0_29, %55, %c0_30] : memref<1x384x4xbf16, #tpu.memory_space<vmem>>, vector<1x128x4xbf16>
    %57 = vector.shape_cast %56 : vector<1x128x4xbf16> to vector<128x4xbf16>
    %c0_31 = arith.constant 0 : index
    %c28 = arith.constant 28 : index
    %58 = vector.load %arg6[%c0_31, %c28] : memref<128x128xbf16, #tpu.memory_space<vmem>>, vector<128x4xbf16>
    tpu.vector_store %arg6[%c0_31, %c28], %57 {strides = array<i32>} : memref<128x128xbf16, #tpu.memory_space<vmem>>, vector<128x4xbf16>,
    %c8_i32_32 = arith.constant 8 : i32
    %59 = arith.addi %0, %c8_i32_32 : i32
    %c16_i32_33 = arith.constant 16 : i32
    %60 = arith.muli %59, %c16_i32_33 : i32
    %61 = tpu.assume_multiple %60, 16 : i32
    %c0_34 = arith.constant 0 : index
    %62 = arith.index_cast %61 : i32 to index
    %c0_35 = arith.constant 0 : index
    %63 = vector.load %arg2[%c0_34, %62, %c0_35] : memref<1x384x4xbf16, #tpu.memory_space<vmem>>, vector<1x128x4xbf16>
    %64 = vector.shape_cast %63 : vector<1x128x4xbf16> to vector<128x4xbf16>
    %c0_36 = arith.constant 0 : index
    %c32 = arith.constant 32 : index
    %65 = vector.load %arg6[%c0_36, %c32] : memref<128x128xbf16, #tpu.memory_space<vmem>>, vector<128x4xbf16>
    tpu.vector_store %arg6[%c0_36, %c32], %64 {strides = array<i32>} : memref<128x128xbf16, #tpu.memory_space<vmem>>, vector<128x4xbf16>,
    %c0_37 = arith.constant 0 : index
    %c0_38 = arith.constant 0 : index
    %66 = vector.load %arg6[%c0_37, %c0_38] : memref<128x128xbf16, #tpu.memory_space<vmem>>, vector<128x128xbf16>
    %c0_39 = arith.constant 0 : index
    %c0_40 = arith.constant 0 : index
    %67 = vector.load %arg3[%c0_39, %c0_40] : memref<128x128xbf16, #tpu.memory_space<vmem>>, vector<128x128xbf16>
    %cst_41 = arith.constant dense<0.000000e+00> : vector<128x128xf32>
    %68 = tpu.matmul %66, %67, %cst_41 {dimension_numbers = #tpu.dot_dimension_numbers<[1], [0], [0], [1], [0, 0, 1, 1], [], []>} : vector<128x128xbf16>, vector<128x128xbf16>, vector<128x128xf32> -> vector<128x128xf32>
    %cst_42 = arith.constant dense<0.000000e+00> : vector<128xf32>
    %69 = vector.multi_reduction <add>, %68, %cst_42 [0] : vector<128x128xf32> to vector<128xf32>
    %70 = vector.shape_cast %69 : vector<128xf32> to vector<1x128xf32>
    %cst_43 = arith.constant 7.812500e-03 : f32
    %71 = vector.broadcast %cst_43 : f32 to vector<1x128xf32>
    %72 = arith.mulf %70, %71 : vector<1x128xf32>
    %73 = vector.broadcast %72 : vector<1x128xf32> to vector<128x128xf32>
    %74 = arith.subf %68, %73 : vector<128x128xf32>
    %75 = arith.mulf %74, %74 : vector<128x128xf32>
    %cst_44 = arith.constant dense<0.000000e+00> : vector<128xf32>
    %76 = vector.multi_reduction <add>, %75, %cst_44 [0] : vector<128x128xf32> to vector<128xf32>
    %77 = vector.shape_cast %76 : vector<128xf32> to vector<1x128xf32>
    %78 = arith.truncf %68 : vector<128x128xf32> to vector<128x128xbf16>
    %c0_45 = arith.constant 0 : index
    %c0_46 = arith.constant 0 : index
    %c0_47 = arith.constant 0 : index
    %79 = vector.load %arg4[%c0_45, %c0_46, %c0_47] : memref<1x128x128xbf16, #tpu.memory_space<vmem>>, vector<1x128x128xbf16>
    %80 = vector.shape_cast %79 : vector<1x128x128xbf16> to vector<128x128xbf16>
    %81 = vector.shape_cast %78 : vector<128x128xbf16> to vector<1x128x128xbf16>
    tpu.vector_store %arg4[%c0_45, %c0_46, %c0_47], %81 {strides = array<i32>} : memref<1x128x128xbf16, #tpu.memory_space<vmem>>, vector<1x128x128xbf16>,
    %82 = tpu.concatenate %72, %77 in 0 : vector<1x128xf32>, vector<1x128xf32> -> vector<2x128xf32>
    %c0_48 = arith.constant 0 : index
    %c0_49 = arith.constant 0 : index
    %c0_50 = arith.constant 0 : index
    %c0_51 = arith.constant 0 : index
    %83 = vector.load %arg5[%c0_48, %c0_49, %c0_50, %c0_51] : memref<1x1x2x128xf32, #tpu.memory_space<vmem>>, vector<1x1x2x128xf32>
    %84 = vector.shape_cast %83 : vector<1x1x2x128xf32> to vector<2x128xf32>
    %85 = vector.shape_cast %82 : vector<2x128xf32> to vector<1x1x2x128xf32>
    tpu.vector_store %arg5[%c0_48, %c0_49, %c0_50, %c0_51], %85 {strides = array<i32>} : memref<1x1x2x128xf32, #tpu.memory_space<vmem>>, vector<1x1x2x128xf32>,
    return
  }
  func.func @transform_0(%arg0: i32, %arg1: i32) -> (i32, i32, i32) {
    %c0_i32 = arith.constant 0 : i32
    %c0_i32_0 = arith.constant 0 : i32
    %c0_i32_1 = arith.constant 0 : i32
    return %arg0, %c0_i32, %c0_i32_0 : i32, i32, i32
  }
  func.func @transform_1(%arg0: i32, %arg1: i32) -> (i32, i32) {
    %c0_i32 = arith.constant 0 : i32
    %c0_i32_0 = arith.constant 0 : i32
    %c0_i32_1 = arith.constant 0 : i32
    return %c0_i32, %c0_i32_0 : i32, i32
  }
  func.func @transform_2(%arg0: i32, %arg1: i32) -> (i32, i32, i32) {
    %c0_i32 = arith.constant 0 : i32
    %c0_i32_0 = arith.constant 0 : i32
    return %arg0, %arg1, %c0_i32 : i32, i32, i32
  }
  func.func @transform_3(%arg0: i32, %arg1: i32) -> (i32, i32, i32, i32) {
    %c0_i32 = arith.constant 0 : i32
    %c0_i32_0 = arith.constant 0 : i32
    %c0_i32_1 = arith.constant 0 : i32
    return %arg0, %arg1, %c0_i32, %c0_i32_0 : i32, i32, i32, i32
  }
}

</mosaic_0001>

<bundles_post_ra>
// kernel: tpu_custom_call.1
= control target key start
LH: loop header
LB: loop body
LE: loop exit
PB: predicated region body
PF: predicated region fallthrough
CT: control target
= control target key end

     0   :  { %s2878_s0 = inlined_call_operand.vmem [shape: bf16[2,384,4], index: 0, kind: input, shape index: {}]   ;;  %s2879_s1 = inlined_call_operand.vmem [shape: bf16[128,128], index: 1, kind: input, shape index: {}]   ;;  %s2880_s2 = inlined_call_operand.hbm [shape: bf16[2,256,128], index: 2, kind: output, shape index: {0}]   ;;  %s2881_s3 = inlined_call_operand.hbm [shape: f32[2,2,2,128], index: 3, kind: output, shape index: {1}]  }
   0x1   :  { %2893 = sst [smem:[#allocation12_spill]] %s2878_s0 }
   0x2   :  { %9 = vsyncpa [#allocation4], 0 }
   0x3   :  { %11 = vsyncpa [#allocation4 + $0x1], 0 }
   0x4   :  { %12 = vsyncpa [#allocation6], 0 }
   0x5   :  { %14 = vsyncpa [#allocation6 + $0x1], 0  ;;  %s2103_s12 = smov 0   ;;  %s2105_s13 = smov 0  }
   0x6   :  { %s2107_s14 = smov 0   ;;  %s2109_s15 = smov 0  }
   0x7   :  { %s2111_s16 = smov 0   ;;  %s2113_s17 = smov 0  }
   0x8   :  { %s2115_s18 = smov 0   ;;  %s2117_s19 = smov 0  }
   0x9 LB: > { %2894 = sst [smem:[#allocation9_spill]] %s2065_s18  ;;  %s1625_s20 = sadd.s32 4294967295, %s2069_s19   ;;  %s2069_s19 = sphi %s2117_s19, %s20_s19   ;;  %s2065_s18 = sphi %s2115_s18, %s2906_s18   ;;  %s2061_s17 = sphi %s2113_s17, %s2911_s17   ;;  %s2057_s16 = sphi %s2111_s16, %s2904_s16   ;;  %s2053_s15 = sphi %s2109_s15, %s2910_s15   ;;  %s2049_s14 = sphi %s2107_s14, %s2909_s14   ;;  %s2045_s13 = sphi %s2105_s13, %s2908_s13   ;;  %s2041_s12 = sphi %s2103_s12, %s2907_s12  }
   0xa   : > { %s1626_s21 = sadd.s32 4294967294, %s2069_s19   ;;  %s29_s22 = sadd.s32 1, %s2061_s17 }
   0xb   : > { %p30_p0 = scmp.ge.s32.totalorder %s29_s22, 2  ;;  %s32_s23 = sadd.s32 1, %s2065_s18 }
   0xc   : > { %p98_p1 = scmp.ne.s32.totalorder %s2049_s14, %s2045_s13  ;;  %p99_p2 = scmp.eq.s32.totalorder %s1625_s20, 3 }
   0xd   : > { %s2913_s22 = smov (%p30_p0, %s29_s22), 0  ;;  %s2915_s23 = smov (!%p30_p0, %s32_s23), %s2065_s18 }
   0xe   : > { %2895 = sst [smem:[#allocation10_spill]] %s2913_s22  ;;  %s84_s24 = ssub.s32 %s2061_s17, %s2913_s22 }
   0xf   : > { %p2154_p3 = por %p99_p2, %p98_p1  ;;  %p34_p4 = scmp.ge.s32.totalorder %s2915_s23, 2 }
  0x10   : > { %p104_p5 = scmp.ne.s32.totalorder %s2045_s13, %s2041_s12  ;;  %p105_p6 = scmp.eq.s32.totalorder %s1626_s21, 3 }
  0x11   : > { %p1629_p7 = scmp.ge.s32.totalorder %s2069_s19, 1  ;;  %s2917_s23 = smov (%p34_p4, %s2915_s23), 0 }
  0x12   : > { %2897 = sst [smem:[#allocation11_spill]] %s2917_s23  ;;  %p2163_p8 = por %p105_p6, %p104_p5 }
  0x13   : > { %p162_p9 = scmp.lt.s32.totalorder %s2069_s19, 5  ;;  %s83_s27 = ssub.s32 %s2065_s18, %s2917_s23 }
  0x14   : > { %s88_s28 = sadd.s32 1, %s2049_s14  ;;  %s85_s29 = sor.u32 %s84_s24, %s83_s27 }
  0x15   : > { %p163_p10 = pnand %p1629_p7, %p162_p9  ;;  %p86_p11 = scmp.eq.s32.totalorder %s85_s29, 0 }
  0x16   : > { %p191_p12 = scmp.lt.s32.totalorder (!%p163_p10), %s2057_s16, 1  ;;  %s2176_s4 = sshll.u32 (!%p163_p10), %s2053_s15, 7 }
  0x17   : > { %s2172_s30 = scalar_select %p86_p11, %s2049_s14, %s88_s28  }
  0x18   : > { %166 = sbr.rel (%p163_p10) target bundleno = 701 (0x2bd), region = 28  ;;  %s1694_s5 = sadd.s32 (!%p163_p10), 16, %s2176_s4 }
  0x19   : > { %s256_s7 = sshra.s32 (!%p163_p10), %s1694_s5, 3  ;;  %s1696_s8 = sadd.s32 (!%p163_p10), 32, %s2176_s4 }
  0x1a   : > { %s1637_s10 = sshll.u32 (!%p163_p10), %s256_s7, 2  ;;  %s359_s11 = sshra.s32 (!%p163_p10), %s1696_s8, 3 }
  0x1b   : > { %s2899_s0 = sld [smem:[#allocation12_spill]] (!%p163_p10)  ;;  %s1639_s28 = sshll.u32 (!%p163_p10), %s359_s11, 2 }
  0x1c   : > { %s2884_s29 = smov (!%p163_p10), 4   ;;  %s1698_s5 = sadd.s32 (!%p163_p10), 48, %s2176_s4 }
  0x1d   : > { %vm199_vm0 = vcmask 1043744   ;;  %v2071_v0 = vmov 0   ;;  %s192_s6 = scalar_select %p191_p12, %s2057_s16, 1  ;;  %vm237_vm1 = vcmask 27648   ;;  %v1931_v25 = vld [vmem:[%s2879_s1 + $0x38] sm:$0xff]   ;;  %v1932_v26 = vld [vmem:[%s2879_s1 + $0x30] sm:$0xff]  }
  0x1e   : > { %202 = vst.msk [vmem:[#allocation2 + $0x8] sm:$0xf] %vm199_vm0, %v2071_v0  ;;  %200 = vst.msk [vmem:[#allocation2] sm:$0xf] %vm199_vm0, %v2071_v0  ;;  %s462_s7 = sshra.s32 %s1698_s5, 3  ;;  %s1702_s5 = sadd.s32 80, %s2176_s4  ;;  %1796 = vmatprep.subr.bf16.mxu0 %v1931_v25  ;;  %1828 = vmatprep.subr.bf16.mxu1 %v1931_v25 }
  0x1f   : > { %201 = vst.msk [vmem:[#allocation2 + $0x4] sm:$0xf] %vm199_vm0, %v2071_v0  ;;  %203 = vst.msk [vmem:[#allocation2 + $0xc] sm:$0xf] %vm199_vm0, %v2071_v0  ;;  %s1844_s9 = smul.u32 192, %s192_s6  ;;  %s1641_s8 = sshll.u32 %s462_s7, 2  ;;  %1797 = vmatpush3.bf16.msra.mxu0 %v1931_v25  ;;  %1836 = vmatpush3.bf16.msra.mxu1 %v1931_v25 }
  0x20   : > { %204 = vst.msk [vmem:[#allocation2 + $0x10] sm:$0xf] %vm199_vm0, %v2071_v0  ;;  %205 = vst.msk [vmem:[#allocation2 + $0x14] sm:$0xf] %vm199_vm0, %v2071_v0  ;;  %1798 = vmatprep.subr.bf16.mxu0 %v1932_v26  ;;  %v1933_v29 = vld [vmem:[%s2879_s1 + $0x28] sm:$0xff]   ;;  %1829 = vmatprep.subr.bf16.mxu1 %v1932_v26  ;;  %v1934_v32 = vld [vmem:[%s2879_s1 + $0x20] sm:$0xff]  }
  0x21   : > { %206 = vst.msk [vmem:[#allocation2 + $0x18] sm:$0xf] %vm199_vm0, %v2071_v0  ;;  %207 = vst.msk [vmem:[#allocation2 + $0x1c] sm:$0xf] %vm199_vm0, %v2071_v0  ;;  %s2202_s24 = scalar_lea.vmem %s2899_s0, %s1844_s9  ;;  %s2882_s9 = smov 8   ;;  %v1935_v37 = vld [vmem:[%s2879_s1 + $0x18] sm:$0xff]  }
  0x22   : > { %208 = vst.msk [vmem:[#allocation2 + $0x20] sm:$0xf] %vm199_vm0, %v2071_v0  ;;  %209 = vst.msk [vmem:[#allocation2 + $0x24] sm:$0xf] %vm199_vm0, %v2071_v0  ;;  %s2205_s27 = scalar_lea.vmem %s2202_s24, %s1637_s10  ;;  %s2215_s6 = scalar_lea.vmem %s2202_s24, %s1639_s28  ;;  %v1936_v40 = vld [vmem:[%s2879_s1 + $0x10] sm:$0xff]   ;;  %v1937_v43 = vld [vmem:[%s2879_s1 + $0x8] sm:$0xff]  }
  0x23   : > { %210 = vst.msk [vmem:[#allocation2 + $0x28] sm:$0xf] %vm199_vm0, %v2071_v0  ;;  %211 = vst.msk [vmem:[#allocation2 + $0x2c] sm:$0xf] %vm199_vm0, %v2071_v0  ;;  %v262_v1 = vld [vmem:[%s2205_s27 + $0x8] sm:$0xf]  ;;  %s2227_s11 = scalar_lea.vmem %s2202_s24, %s1641_s8  ;;  %1799 = vmatpush3.bf16.msra.mxu0 %v1932_v26  ;;  %1837 = vmatpush3.bf16.msra.mxu1 %v1932_v26 }
  0x24   : > { %212 = vst.msk [vmem:[#allocation2 + $0x30] sm:$0xf] %vm199_vm0, %v2071_v0  ;;  %213 = vst.msk [vmem:[#allocation2 + $0x34] sm:$0xf] %vm199_vm0, %v2071_v0  ;;  %v260_v2 = vld [vmem:[%s2205_s27] sm:$0xf]  ;;  %296 = vrot.lane.b32.xlu1 %v262_v1, %s2884_s29  ;;  %1800 = vmatprep.subr.bf16.mxu0 %v1933_v29 }
  0x25   : > { %214 = vst.msk [vmem:[#allocation2 + $0x38] sm:$0xf] %vm199_vm0, %v2071_v0  ;;  %215 = vst.msk [vmem:[#allocation2 + $0x3c] sm:$0xf] %vm199_vm0, %v2071_v0  ;;  %292 = vrot.lane.b32.xlu0 %v260_v2, %s2884_s29  ;;  %v263_v3 = vld [vmem:[%s2205_s27 + $0xc] sm:$0xf]  ;;  %1830 = vmatprep.subr.bf16.mxu1 %v1933_v29 }
  0x26   : > { %v261_v4 = vld [vmem:[%s2205_s27 + $0x4] sm:$0xf]  ;;  %v363_v6 = vld [vmem:[%s2215_s6] sm:$0xf]  ;;  %v366_v7 = vld [vmem:[%s2215_s6 + $0xc] sm:$0xf] }
  0x27   : > { %v364_v5 = vld [vmem:[%s2215_s6 + $0x4] sm:$0xf]  ;;  %v365_v8 = vld [vmem:[%s2215_s6 + $0x8] sm:$0xf]  ;;  %s1700_s10 = sadd.s32 64, %s2176_s4  ;;  %s2886_s28 = smov 12   ;;  %1801 = vmatpush3.bf16.msra.mxu0 %v1933_v29  ;;  %1838 = vmatpush3.bf16.msra.mxu1 %v1933_v29 }
  0x28   : > { %298 = vrot.lane.b32.xlu1 %v263_v3, %s2884_s29  ;;  %s565_s20 = sshra.s32 %s1700_s10, 3  ;;  %v467_v9 = vld [vmem:[%s2227_s11 + $0x4] sm:$0xf]  ;;  %v466_v10 = vld [vmem:[%s2227_s11] sm:$0xf]  ;;  %s668_s8 = sshra.s32 %s1702_s5, 3  ;;  %1802 = vmatprep.subr.bf16.mxu0 %v1934_v32 }
  0x29   : > { %294 = vrot.lane.b32.xlu0 %v261_v4, %s2884_s29  ;;  %s1643_s21 = sshll.u32 %s565_s20, 2  ;;  %v469_v11 = vld [vmem:[%s2227_s11 + $0xc] sm:$0xf]  ;;  %v468_v12 = vld [vmem:[%s2227_s11 + $0x8] sm:$0xf]  ;;  %s217_s10 = sshra.s32 %s2176_s4, 3  ;;  %1831 = vmatprep.subr.bf16.mxu1 %v1934_v32 }
  0x2a   : > { %s2239_s7 = scalar_lea.vmem %s2202_s24, %s1643_s21  ;;  %s1645_s20 = sshll.u32 %s668_s8, 2  ;;  %v265_v46 = vld [vmem:[%s2205_s27 + $0x14] sm:$0xf]  ;;  %v264_v47 = vld [vmem:[%s2205_s27 + $0x10] sm:$0xf]  ;;  %v1939_v48 = vld [vmem:[%s2879_s1] sm:$0xff]  }
  0x2b   : > { %v570_v13 = vld [vmem:[%s2239_s7 + $0x4] sm:$0xf]  ;;  %v569_v14 = vld [vmem:[%s2239_s7] sm:$0xf]  ;;  %s2891_s29 = smov 16   ;;  %s1704_s21 = sadd.s32 96, %s2176_s4  ;;  %1803 = vmatpush3.bf16.msra.mxu0 %v1934_v32  ;;  %1839 = vmatpush3.bf16.msra.mxu1 %v1934_v32 }
  0x2c   : > { %397 = vrot.lane.b32.xlu1 %v364_v5, %s2882_s9  ;;  %v572_v15 = vld [vmem:[%s2239_s7 + $0xc] sm:$0xf]  ;;  %v571_v16 = vld [vmem:[%s2239_s7 + $0x8] sm:$0xf]  ;;  %s2258_s5 = scalar_lea.vmem %s2202_s24, %s1645_s20  ;;  %s1706_s20 = sadd.s32 112, %s2176_s4  ;;  %1804 = vmatprep.subr.bf16.mxu0 %v1935_v37  ;;  %vm340_vm2 = vcmask 60448  }
  0x2d   : > { %395 = vrot.lane.b32.xlu0 %v363_v6, %s2882_s9  ;;  %v673_v21 = vld [vmem:[%s2258_s5 + $0x4] sm:$0xf]  ;;  %v672_v22 = vld [vmem:[%s2258_s5] sm:$0xf]  ;;  %v675_v23 = vld [vmem:[%s2258_s5 + $0xc] sm:$0xf]  ;;  %1832 = vmatprep.subr.bf16.mxu1 %v1935_v37 }
  0x2e   : > { %v674_v24 = vld [vmem:[%s2258_s5 + $0x8] sm:$0xf]  ;;  %v267_v51 = vld [vmem:[%s2205_s27 + $0x1c] sm:$0xf]  ;;  %v266_v52 = vld [vmem:[%s2205_s27 + $0x18] sm:$0xf] }
  0x2f   : > { %1805 = vmatpush3.bf16.msra.mxu0 %v1935_v37  ;;  %1840 = vmatpush3.bf16.msra.mxu1 %v1935_v37  ;;  %v368_v53 = vld [vmem:[%s2215_s6 + $0x14] sm:$0xf]  ;;  %v367_v54 = vld [vmem:[%s2215_s6 + $0x10] sm:$0xf]  ;;  %v370_v55 = vld [vmem:[%s2215_s6 + $0x1c] sm:$0xf] }
  0x30   : > { %401 = vrot.lane.b32.xlu1 %v366_v7, %s2882_s9  ;;  %1806 = vmatprep.subr.bf16.mxu0 %v1936_v40  ;;  %v369_v56 = vld [vmem:[%s2215_s6 + $0x18] sm:$0xf]  ;;  %v471_v57 = vld [vmem:[%s2227_s11 + $0x14] sm:$0xf]  ;;  %v470_v58 = vld [vmem:[%s2227_s11 + $0x10] sm:$0xf] }
  0x31   : > { %399 = vrot.lane.b32.xlu0 %v365_v8, %s2882_s9  ;;  %s1635_s9 = sshll.u32 %s217_s10, 2  ;;  %s2076_s10 = smov 20   ;;  %1833 = vmatprep.subr.bf16.mxu1 %v1936_v40  ;;  %v473_v59 = vld [vmem:[%s2227_s11 + $0x1c] sm:$0xf]  ;;  %v472_v60 = vld [vmem:[%s2227_s11 + $0x18] sm:$0xf] }
  0x32   : > { %s2252_s0 = scalar_lea.vmem %s2202_s24, %s1635_s9  ;;  %s771_s9 = sshra.s32 %s1704_s21, 3  ;;  %v574_v61 = vld [vmem:[%s2239_s7 + $0x14] sm:$0xf]  ;;  %v573_v62 = vld [vmem:[%s2239_s7 + $0x10] sm:$0xf]  ;;  %vm443_vm3 = vcmask 93248  }
  0x33   : > { %v223_v17 = vld [vmem:[%s2252_s0 + $0x8] sm:$0xf]  ;;  %v221_v18 = vld [vmem:[%s2252_s0] sm:$0xf]  ;;  %v224_v19 = vld [vmem:[%s2252_s0 + $0xc] sm:$0xf]  ;;  %1807 = vmatpush3.bf16.msra.mxu0 %v1936_v40  ;;  %1841 = vmatpush3.bf16.msra.mxu1 %v1936_v40 }
  0x34   : > { %500 = vrot.lane.b32.xlu1 %v467_v9, %s2886_s28  ;;  %240 = vst.msk [vmem:[#allocation2 + $0x8] sm:$0xf] %vm237_vm1, %v223_v17  ;;  %238 = vst.msk [vmem:[#allocation2] sm:$0xf] %vm237_vm1, %v221_v18  ;;  %v222_v20 = vld [vmem:[%s2252_s0 + $0x4] sm:$0xf]  ;;  %1808 = vmatprep.subr.bf16.mxu0 %v1937_v43 }
  0x35   : > { %498 = vrot.lane.b32.xlu0 %v466_v10, %s2886_s28  ;;  %241 = vst.msk [vmem:[#allocation2 + $0xc] sm:$0xf] %vm237_vm1, %v224_v19  ;;  %239 = vst.msk [vmem:[#allocation2 + $0x4] sm:$0xf] %vm237_vm1, %v222_v20  ;;  %s1647_s8 = sshll.u32 %s771_s9, 2  ;;  %s874_s21 = sshra.s32 %s1706_s20, 3  ;;  %1834 = vmatprep.subr.bf16.mxu1 %v1937_v43 }
  0x36   : > { %s2278_s22 = scalar_lea.vmem %s2202_s24, %s1647_s8  ;;  %s1649_s23 = sshll.u32 %s874_s21, 2  ;;  %v226_v35 = vld [vmem:[%s2252_s0 + $0x14] sm:$0xf]  ;;  %v225_v36 = vld [vmem:[%s2252_s0 + $0x10] sm:$0xf]  ;;  %vm546_vm4 = vcmask 126048  }
  0x37   : > { %v776_v27 = vld [vmem:[%s2278_s22 + $0x4] sm:$0xf]  ;;  %v775_v28 = vld [vmem:[%s2278_s22] sm:$0xf]  ;;  %v778_v30 = vld [vmem:[%s2278_s22 + $0xc] sm:$0xf]  ;;  %s2295_s9 = scalar_lea.vmem %s2202_s24, %s1649_s23  ;;  %1809 = vmatpush3.bf16.msra.mxu0 %v1937_v43  ;;  %1842 = vmatpush3.bf16.msra.mxu1 %v1937_v43 }
  0x38   : > { %504 = vrot.lane.b32.xlu1 %v469_v11, %s2886_s28  ;;  %v777_v31 = vld [vmem:[%s2278_s22 + $0x8] sm:$0xf]  ;;  %s1708_s8 = sadd.s32 128, %s2176_s4  ;;  %v879_v33 = vld [vmem:[%s2295_s9 + $0x4] sm:$0xf]  ;;  %s2078_s20 = smov 28   ;;  %1810 = vmatprep.subr.bf16.mxu0 %v1939_v48 }
  0x39   : > { %502 = vrot.lane.b32.xlu0 %v468_v12, %s2886_s28  ;;  %s2077_s28 = smov 24   ;;  %s977_s18 = sshra.s32 %s1708_s8, 3  ;;  %v878_v34 = vld [vmem:[%s2295_s9] sm:$0xf]  ;;  %243 = vst.msk [vmem:[#allocation2 + $0x14] sm:$0xf] %vm237_vm1, %v226_v35  ;;  %1835 = vmatprep.subr.bf16.mxu1 %v1939_v48 }
  0x3a   : > { %242 = vst.msk [vmem:[#allocation2 + $0x10] sm:$0xf] %vm237_vm1, %v225_v36  ;;  %v881_v38 = vld [vmem:[%s2295_s9 + $0xc] sm:$0xf]  ;;  %v880_v39 = vld [vmem:[%s2295_s9 + $0x8] sm:$0xf] }
  0x3b   : > { %v228_v44 = vld [vmem:[%s2252_s0 + $0x1c] sm:$0xf]  ;;  %v227_v45 = vld [vmem:[%s2252_s0 + $0x18] sm:$0xf]  ;;  %s2079_s23 = smov 32   ;;  %s2900_s4 = smov 4   ;;  %1811 = vmatpush3.bf16.msra.mxu0 %v1939_v48  ;;  %1843 = vmatpush3.bf16.msra.mxu1 %v1939_v48 }
  0x3c   : > { %603 = vrot.lane.b32.xlu1 %v570_v13, %s2891_s29  ;;  %245 = vst.msk [vmem:[#allocation2 + $0x1c] sm:$0xf] %vm237_vm1, %v228_v44  ;;  %244 = vst.msk [vmem:[#allocation2 + $0x18] sm:$0xf] %vm237_vm1, %v227_v45  ;;  %v576_v63 = vld [vmem:[%s2239_s7 + $0x1c] sm:$0xf] }
  0x3d   : > { %601 = vrot.lane.b32.xlu0 %v569_v14, %s2891_s29  ;;  %v575_v0 = vld [vmem:[%s2239_s7 + $0x18] sm:$0xf]  ;;  %v677_v1 = vld [vmem:[%s2258_s5 + $0x14] sm:$0xf]  ;;  %v676_v2 = vld [vmem:[%s2258_s5 + $0x10] sm:$0xf] }
  0x3e   : > { %v679_v3 = vld [vmem:[%s2258_s5 + $0x1c] sm:$0xf]  ;;  %v678_v4 = vld [vmem:[%s2258_s5 + $0x18] sm:$0xf]  ;;  %v780_v5 = vld [vmem:[%s2278_s22 + $0x14] sm:$0xf] }
  0x3f   : > { %v779_v6 = vld [vmem:[%s2278_s22 + $0x10] sm:$0xf]  ;;  %v782_v7 = vld [vmem:[%s2278_s22 + $0x1c] sm:$0xf]  ;;  %v781_v8 = vld [vmem:[%s2278_s22 + $0x18] sm:$0xf] }
  0x40   : > { %607 = vrot.lane.b32.xlu1 %v572_v15, %s2891_s29  ;;  %v883_v9 = vld [vmem:[%s2295_s9 + $0x14] sm:$0xf]  ;;  %v882_v10 = vld [vmem:[%s2295_s9 + $0x10] sm:$0xf]  ;;  %v230_v11 = vld [vmem:[%s2252_s0 + $0x24] sm:$0xf] }
  0x41   : > { %605 = vrot.lane.b32.xlu0 %v571_v16, %s2891_s29  ;;  %s1651_s29 = sshll.u32 %s977_s18, 2  ;;  %s2902_s18 = smov 12   ;;  %v229_v12 = vld [vmem:[%s2252_s0 + $0x20] sm:$0xf]  ;;  %247 = vst.msk [vmem:[#allocation2 + $0x24] sm:$0xf] %vm237_vm1, %v230_v11 }
  0x42   : > { %s2317_s8 = scalar_lea.vmem %s2202_s24, %s1651_s29  ;;  %s2901_s24 = smov 8   ;;  %246 = vst.msk [vmem:[#allocation2 + $0x20] sm:$0xf] %vm237_vm1, %v229_v12  ;;  %v885_v13 = vld [vmem:[%s2295_s9 + $0x1c] sm:$0xf]  ;;  %vm649_vm5 = vcmask 158848  }
  0x43   : > { %v982_v41 = vld [vmem:[%s2317_s8 + $0x4] sm:$0xf]  ;;  %v981_v42 = vld [vmem:[%s2317_s8] sm:$0xf]  ;;  %v984_v49 = vld [vmem:[%s2317_s8 + $0xc] sm:$0xf] }
  0x44   : > { %706 = vrot.lane.b32.xlu1 %v673_v21, %s2076_s10  ;;  %v983_v50 = vld [vmem:[%s2317_s8 + $0x8] sm:$0xf]  ;;  %s2903_s29 = smov 16   ;;  %v884_v14 = vld [vmem:[%s2295_s9 + $0x18] sm:$0xf]  ;;  %vm752_vm6 = vcmask 191648  }
  0x45   : > { %704 = vrot.lane.b32.xlu0 %v672_v22, %s2076_s10  ;;  %v986_v17 = vld [vmem:[%s2317_s8 + $0x14] sm:$0xf]  ;;  %v985_v18 = vld [vmem:[%s2317_s8 + $0x10] sm:$0xf]  ;;  %v232_v21 = vld [vmem:[%s2252_s0 + $0x2c] sm:$0xf] }
  0x46   : > { %v231_v22 = vld [vmem:[%s2252_s0 + $0x28] sm:$0xf]  ;;  %249 = vst.msk [vmem:[#allocation2 + $0x2c] sm:$0xf] %vm237_vm1, %v232_v21  ;;  %v372_v35 = vld [vmem:[%s2215_s6 + $0x24] sm:$0xf] }
  0x47   : > { %248 = vst.msk [vmem:[#allocation2 + $0x28] sm:$0xf] %vm237_vm1, %v231_v22  ;;  %v270_v32 = vld [vmem:[%s2205_s27 + $0x28] sm:$0xf]  ;;  %v371_v36 = vld [vmem:[%s2215_s6 + $0x20] sm:$0xf] }
  0x48   : > { %710 = vrot.lane.b32.xlu1 %v675_v23, %s2076_s10  ;;  %v269_v23 = vld [vmem:[%s2205_s27 + $0x24] sm:$0xf]  ;;  %v373_v40 = vld [vmem:[%s2215_s6 + $0x28] sm:$0xf]  ;;  %v474_v44 = vld [vmem:[%s2227_s11 + $0x20] sm:$0xf] }
  0x49   : > { %708 = vrot.lane.b32.xlu0 %v674_v24, %s2076_s10  ;;  %v268_v24 = vld [vmem:[%s2205_s27 + $0x20] sm:$0xf]  ;;  %v475_v43 = vld [vmem:[%s2227_s11 + $0x24] sm:$0xf]  ;;  %v476_v48 = vld [vmem:[%s2227_s11 + $0x28] sm:$0xf] }
  0x4a   : > { %vm855_vm7 = vcmask 224448   ;;  %vm958_vm8 = vcmask 257248   ;;  %vm1061_vm9 = vcmask 290048   ;;  %v887_v11 = vld [vmem:[%s2295_s9 + $0x24] sm:$0xf]  ;;  %s2080_s21 = smov [#allocation3]  }
  0x4b   : > { %v886_v12 = vld [vmem:[%s2295_s9 + $0x20] sm:$0xf]  ;;  %v990_v22 = vld [vmem:[%s2317_s8 + $0x24] sm:$0xf] }
  0x4c   : > { %809 = vrot.lane.b32.xlu1 %v776_v27, %s2077_s28  ;;  %v988_v27 = vld [vmem:[%s2317_s8 + $0x1c] sm:$0xf] }
  0x4d   : > { %807 = vrot.lane.b32.xlu0 %v775_v28, %s2077_s28  ;;  %v987_v28 = vld [vmem:[%s2317_s8 + $0x18] sm:$0xf] }
  0x50   : > { %813 = vrot.lane.b32.xlu1 %v778_v30, %s2077_s28 }
  0x51   : > { %811 = vrot.lane.b32.xlu0 %v777_v31, %s2077_s28  ;;  %v271_v31 = vld [vmem:[%s2205_s27 + $0x2c] sm:$0xf] }
  0x54   : > { %912 = vrot.lane.b32.xlu1 %v879_v33, %s2078_s20 }
  0x55   : > { %910 = vrot.lane.b32.xlu0 %v878_v34, %s2078_s20 }
  0x58   : > { %916 = vrot.lane.b32.xlu1 %v881_v38, %s2078_s20 }
  0x59   : > { %914 = vrot.lane.b32.xlu0 %v880_v39, %s2078_s20  ;;  %v374_v39 = vld [vmem:[%s2215_s6 + $0x2c] sm:$0xf] }
  0x5c   : > { %1015 = vrot.lane.b32.xlu1 %v982_v41, %s2079_s23 }
  0x5d   : > { %1013 = vrot.lane.b32.xlu0 %v981_v42, %s2079_s23 }
  0x60   : > { %302 = vrot.lane.b32.xlu1 %v265_v46, %s2900_s4 }
  0x61   : > { %300 = vrot.lane.b32.xlu0 %v264_v47, %s2900_s4  ;;  %v477_v47 = vld [vmem:[%s2227_s11 + $0x2c] sm:$0xf] }
  0x64   : > { %1019 = vrot.lane.b32.xlu1 %v984_v49, %s2079_s23 }
  0x65   : > { %1017 = vrot.lane.b32.xlu0 %v983_v50, %s2079_s23 }
  0x68   : > { %306 = vrot.lane.b32.xlu1 %v267_v51, %s2900_s4  ;;  %v578_v51 = vld [vmem:[%s2239_s7 + $0x24] sm:$0xf] }
  0x69   : > { %304 = vrot.lane.b32.xlu0 %v266_v52, %s2900_s4  ;;  %v577_v52 = vld [vmem:[%s2239_s7 + $0x20] sm:$0xf] }
  0x6c   : > { %405 = vrot.lane.b32.xlu1 %v368_v53, %s2901_s24 }
  0x6d   : > { %403 = vrot.lane.b32.xlu0 %v367_v54, %s2901_s24 }
  0x70   : > { %409 = vrot.lane.b32.xlu1 %v370_v55, %s2901_s24  ;;  %v580_v55 = vld [vmem:[%s2239_s7 + $0x2c] sm:$0xf] }
  0x71   : > { %407 = vrot.lane.b32.xlu0 %v369_v56, %s2901_s24  ;;  %v579_v56 = vld [vmem:[%s2239_s7 + $0x28] sm:$0xf] }
  0x74   : > { %508 = vrot.lane.b32.xlu1 %v471_v57, %s2902_s18 }
  0x75   : > { %506 = vrot.lane.b32.xlu0 %v470_v58, %s2902_s18 }
  0x78   : > { %512 = vrot.lane.b32.xlu1 %v473_v59, %s2902_s18  ;;  %v681_v59 = vld [vmem:[%s2258_s5 + $0x24] sm:$0xf] }
  0x79   : > { %510 = vrot.lane.b32.xlu0 %v472_v60, %s2902_s18  ;;  %v680_v60 = vld [vmem:[%s2258_s5 + $0x20] sm:$0xf] }
  0x7c   : > { %611 = vrot.lane.b32.xlu1 %v574_v61, %s2903_s29 }
  0x7d   : > { %609 = vrot.lane.b32.xlu0 %v573_v62, %s2903_s29 }
  0x80   : > { %615 = vrot.lane.b32.xlu1 %v576_v63, %s2903_s29  ;;  %v683_v63 = vld [vmem:[%s2258_s5 + $0x2c] sm:$0xf] }
  0x81   : > { %613 = vrot.lane.b32.xlu0 %v575_v0, %s2903_s29  ;;  %v682_v0 = vld [vmem:[%s2258_s5 + $0x28] sm:$0xf] }
  0x84   : > { %714 = vrot.lane.b32.xlu1 %v677_v1, %s2076_s10 }
  0x85   : > { %712 = vrot.lane.b32.xlu0 %v676_v2, %s2076_s10 }
  0x88   : > { %718 = vrot.lane.b32.xlu1 %v679_v3, %s2076_s10  ;;  %v784_v3 = vld [vmem:[%s2278_s22 + $0x24] sm:$0xf] }
  0x89   : > { %716 = vrot.lane.b32.xlu0 %v678_v4, %s2076_s10  ;;  %v783_v4 = vld [vmem:[%s2278_s22 + $0x20] sm:$0xf] }
  0x8c   : > { %817 = vrot.lane.b32.xlu1 %v780_v5, %s2077_s28 }
  0x8d   : > { %815 = vrot.lane.b32.xlu0 %v779_v6, %s2077_s28 }
  0x90   : > { %821 = vrot.lane.b32.xlu1 %v782_v7, %s2077_s28  ;;  %v786_v7 = vld [vmem:[%s2278_s22 + $0x2c] sm:$0xf] }
  0x91   : > { %819 = vrot.lane.b32.xlu0 %v781_v8, %s2077_s28  ;;  %v785_v8 = vld [vmem:[%s2278_s22 + $0x28] sm:$0xf] }
  0x94   : > { %920 = vrot.lane.b32.xlu1 %v883_v9, %s2078_s20 }
  0x95   : > { %918 = vrot.lane.b32.xlu0 %v882_v10, %s2078_s20 }
  0x96   : > { %v297_v15 = vpop.permute.xlu1 %296 }
  0x97   : > { %v293_v16 = vpop.permute.xlu0 %292  ;;  %343 = vst.msk [vmem:[#allocation2 + $0x8] sm:$0xf] %vm340_vm2, %v297_v15  ;;  %v234_v15 = vld [vmem:[%s2252_s0 + $0x34] sm:$0xf] }
  0x98   : > { %341 = vst.msk [vmem:[#allocation2] sm:$0xf] %vm340_vm2, %v293_v16  ;;  %924 = vrot.lane.b32.xlu1 %v885_v13, %s2078_s20  ;;  %v233_v16 = vld [vmem:[%s2252_s0 + $0x30] sm:$0xf] }
  0x99   : > { %922 = vrot.lane.b32.xlu0 %v884_v14, %s2078_s20  ;;  %251 = vst.msk [vmem:[#allocation2 + $0x34] sm:$0xf] %vm237_vm1, %v234_v15  ;;  %250 = vst.msk [vmem:[#allocation2 + $0x30] sm:$0xf] %vm237_vm1, %v233_v16 }
  0x9a   : > { %v299_v19 = vpop.permute.xlu1 %298 }
  0x9b   : > { %v295_v20 = vpop.permute.xlu0 %294  ;;  %344 = vst.msk [vmem:[#allocation2 + $0xc] sm:$0xf] %vm340_vm2, %v299_v19 }
  0x9c   : > { %342 = vst.msk [vmem:[#allocation2 + $0x4] sm:$0xf] %vm340_vm2, %v295_v20  ;;  %1023 = vrot.lane.b32.xlu1 %v986_v17, %s2079_s23  ;;  %v889_v17 = vld [vmem:[%s2295_s9 + $0x2c] sm:$0xf] }
  0x9d   : > { %1021 = vrot.lane.b32.xlu0 %v985_v18, %s2079_s23  ;;  %v888_v18 = vld [vmem:[%s2295_s9 + $0x28] sm:$0xf] }
  0x9e   : > { %v398_v25 = vpop.permute.xlu1 %397 }
  0x9f   : > { %v396_v26 = vpop.permute.xlu0 %395  ;;  %445 = vst.msk [vmem:[#allocation2 + $0x4] sm:$0xf] %vm443_vm3, %v398_v25 }
  0xa0   : > { %444 = vst.msk [vmem:[#allocation2] sm:$0xf] %vm443_vm3, %v396_v26  ;;  %310 = vrot.lane.b32.xlu1 %v269_v23, %s2900_s4  ;;  %v989_v23 = vld [vmem:[%s2317_s8 + $0x20] sm:$0xf]  ;;  %v236_v26 = vld [vmem:[%s2252_s0 + $0x3c] sm:$0xf] }
  0xa1   : > { %308 = vrot.lane.b32.xlu0 %v268_v24, %s2900_s4  ;;  %253 = vst.msk [vmem:[#allocation2 + $0x3c] sm:$0xf] %vm237_vm1, %v236_v26  ;;  %v994_v26 = vld [vmem:[%s2317_s8 + $0x34] sm:$0xf] }
  0xa2   : > { %v402_v29 = vpop.permute.xlu1 %401 }
  0xa3   : > { %v400_v30 = vpop.permute.xlu0 %399  ;;  %447 = vst.msk [vmem:[#allocation2 + $0xc] sm:$0xf] %vm443_vm3, %v402_v29  ;;  %v272_v29 = vld [vmem:[%s2205_s27 + $0x30] sm:$0xf] }
  0xa4   : > { %446 = vst.msk [vmem:[#allocation2 + $0x8] sm:$0xf] %vm443_vm3, %v400_v30  ;;  %1027 = vrot.lane.b32.xlu1 %v988_v27, %s2079_s23  ;;  %v235_v27 = vld [vmem:[%s2252_s0 + $0x38] sm:$0xf]  ;;  %s2679_s0 = sand.u32 1, %s2045_s13  }
  0xa5   : > { %1025 = vrot.lane.b32.xlu0 %v987_v28, %s2079_s23  ;;  %252 = vst.msk [vmem:[#allocation2 + $0x38] sm:$0xf] %vm237_vm1, %v235_v27  ;;  %v273_v28 = vld [vmem:[%s2205_s27 + $0x34] sm:$0xf]  ;;  %v993_v27 = vld [vmem:[%s2317_s8 + $0x30] sm:$0xf] }
  0xa6   : > { %v501_v33 = vpop.permute.xlu1 %500 }
  0xa7   : > { %v499_v34 = vpop.permute.xlu0 %498  ;;  %548 = vst.msk [vmem:[#allocation2 + $0x4] sm:$0xf] %vm546_vm4, %v501_v33  ;;  %v992_v33 = vld [vmem:[%s2317_s8 + $0x2c] sm:$0xf] }
  0xa8   : > { %547 = vst.msk [vmem:[#allocation2] sm:$0xf] %vm546_vm4, %v499_v34  ;;  %314 = vrot.lane.b32.xlu1 %v271_v31, %s2900_s4  ;;  %v991_v34 = vld [vmem:[%s2317_s8 + $0x28] sm:$0xf] }
  0xa9   : > { %312 = vrot.lane.b32.xlu0 %v270_v32, %s2900_s4 }
  0xaa   : > { %v505_v37 = vpop.permute.xlu1 %504 }
  0xab   : > { %v503_v38 = vpop.permute.xlu0 %502  ;;  %550 = vst.msk [vmem:[#allocation2 + $0xc] sm:$0xf] %vm546_vm4, %v505_v37  ;;  %v275_v37 = vld [vmem:[%s2205_s27 + $0x3c] sm:$0xf] }
  0xac   : > { %549 = vst.msk [vmem:[#allocation2 + $0x8] sm:$0xf] %vm546_vm4, %v503_v38  ;;  %413 = vrot.lane.b32.xlu1 %v372_v35, %s2901_s24  ;;  %v274_v38 = vld [vmem:[%s2205_s27 + $0x38] sm:$0xf] }
  0xad   : > { %411 = vrot.lane.b32.xlu0 %v371_v36, %s2901_s24 }
  0xae   : > { %v604_v41 = vpop.permute.xlu1 %603 }
  0xaf   : > { %v602_v42 = vpop.permute.xlu0 %601  ;;  %651 = vst.msk [vmem:[#allocation2 + $0x4] sm:$0xf] %vm649_vm5, %v604_v41  ;;  %v376_v41 = vld [vmem:[%s2215_s6 + $0x34] sm:$0xf] }
  0xb0   : > { %650 = vst.msk [vmem:[#allocation2] sm:$0xf] %vm649_vm5, %v602_v42  ;;  %417 = vrot.lane.b32.xlu1 %v374_v39, %s2901_s24  ;;  %v375_v42 = vld [vmem:[%s2215_s6 + $0x30] sm:$0xf] }
  0xb1   : > { %415 = vrot.lane.b32.xlu0 %v373_v40, %s2901_s24 }
  0xb2   : > { %v608_v45 = vpop.permute.xlu1 %607 }
  0xb3   : > { %v606_v46 = vpop.permute.xlu0 %605  ;;  %653 = vst.msk [vmem:[#allocation2 + $0xc] sm:$0xf] %vm649_vm5, %v608_v45  ;;  %v378_v45 = vld [vmem:[%s2215_s6 + $0x3c] sm:$0xf] }
  0xb4   : > { %652 = vst.msk [vmem:[#allocation2 + $0x8] sm:$0xf] %vm649_vm5, %v606_v46  ;;  %516 = vrot.lane.b32.xlu1 %v475_v43, %s2902_s18  ;;  %v377_v46 = vld [vmem:[%s2215_s6 + $0x38] sm:$0xf]  ;;  %s1686_s6 = sshll.u32 %s2053_s15, 4 }
  0xb5   : > { %514 = vrot.lane.b32.xlu0 %v474_v44, %s2902_s18 }
  0xb6   : > { %v707_v49 = vpop.permute.xlu1 %706 }
  0xb7   : > { %v705_v50 = vpop.permute.xlu0 %704  ;;  %754 = vst.msk [vmem:[#allocation2 + $0x4] sm:$0xf] %vm752_vm6, %v707_v49  ;;  %v479_v49 = vld [vmem:[%s2227_s11 + $0x34] sm:$0xf] }
  0xb8   : > { %753 = vst.msk [vmem:[#allocation2] sm:$0xf] %vm752_vm6, %v705_v50  ;;  %520 = vrot.lane.b32.xlu1 %v477_v47, %s2902_s18  ;;  %v478_v50 = vld [vmem:[%s2227_s11 + $0x30] sm:$0xf] }
  0xb9   : > { %518 = vrot.lane.b32.xlu0 %v476_v48, %s2902_s18 }
  0xba   : > { %v711_v53 = vpop.permute.xlu1 %710 }
  0xbb   : > { %v709_v54 = vpop.permute.xlu0 %708  ;;  %756 = vst.msk [vmem:[#allocation2 + $0xc] sm:$0xf] %vm752_vm6, %v711_v53  ;;  %v481_v53 = vld [vmem:[%s2227_s11 + $0x3c] sm:$0xf] }
  0xbc   : > { %755 = vst.msk [vmem:[#allocation2 + $0x8] sm:$0xf] %vm752_vm6, %v709_v54  ;;  %619 = vrot.lane.b32.xlu1 %v578_v51, %s2903_s29  ;;  %v480_v54 = vld [vmem:[%s2227_s11 + $0x38] sm:$0xf]  ;;  %s1687_s11 = sshll.u32 %s2057_s16, 5 }
  0xbd   : > { %617 = vrot.lane.b32.xlu0 %v577_v52, %s2903_s29 }
  0xbe   : > { %v810_v57 = vpop.permute.xlu1 %809 }
  0xbf   : > { %v808_v58 = vpop.permute.xlu0 %807  ;;  %857 = vst.msk [vmem:[#allocation2 + $0x4] sm:$0xf] %vm855_vm7, %v810_v57  ;;  %v582_v57 = vld [vmem:[%s2239_s7 + $0x34] sm:$0xf] }
  0xc0   : > { %856 = vst.msk [vmem:[#allocation2] sm:$0xf] %vm855_vm7, %v808_v58  ;;  %623 = vrot.lane.b32.xlu1 %v580_v55, %s2903_s29  ;;  %v581_v58 = vld [vmem:[%s2239_s7 + $0x30] sm:$0xf] }
  0xc1   : > { %621 = vrot.lane.b32.xlu0 %v579_v56, %s2903_s29 }
  0xc2   : > { %v814_v61 = vpop.permute.xlu1 %813 }
  0xc3   : > { %v812_v62 = vpop.permute.xlu0 %811  ;;  %859 = vst.msk [vmem:[#allocation2 + $0xc] sm:$0xf] %vm855_vm7, %v814_v61  ;;  %v584_v61 = vld [vmem:[%s2239_s7 + $0x3c] sm:$0xf] }
  0xc4   : > { %858 = vst.msk [vmem:[#allocation2 + $0x8] sm:$0xf] %vm855_vm7, %v812_v62  ;;  %722 = vrot.lane.b32.xlu1 %v681_v59, %s2076_s10  ;;  %v583_v62 = vld [vmem:[%s2239_s7 + $0x38] sm:$0xf]  ;;  %s1479_s7 = sadd.s32 %s1687_s11, %s1686_s6 }
  0xc5   : > { %720 = vrot.lane.b32.xlu0 %v680_v60, %s2076_s10 }
  0xc6   : > { %v913_v1 = vpop.permute.xlu1 %912 }
  0xc7   : > { %v911_v2 = vpop.permute.xlu0 %910  ;;  %960 = vst.msk [vmem:[#allocation2 + $0x4] sm:$0xf] %vm958_vm8, %v913_v1  ;;  %v685_v1 = vld [vmem:[%s2258_s5 + $0x34] sm:$0xf] }
  0xc8   : > { %959 = vst.msk [vmem:[#allocation2] sm:$0xf] %vm958_vm8, %v911_v2  ;;  %726 = vrot.lane.b32.xlu1 %v683_v63, %s2076_s10  ;;  %v684_v2 = vld [vmem:[%s2258_s5 + $0x30] sm:$0xf] }
  0xc9   : > { %724 = vrot.lane.b32.xlu0 %v682_v0, %s2076_s10 }
  0xca   : > { %v917_v5 = vpop.permute.xlu1 %916 }
  0xcb   : > { %v915_v6 = vpop.permute.xlu0 %914  ;;  %962 = vst.msk [vmem:[#allocation2 + $0xc] sm:$0xf] %vm958_vm8, %v917_v5  ;;  %v687_v5 = vld [vmem:[%s2258_s5 + $0x3c] sm:$0xf] }
  0xcc   : > { %961 = vst.msk [vmem:[#allocation2 + $0x8] sm:$0xf] %vm958_vm8, %v915_v6  ;;  %825 = vrot.lane.b32.xlu1 %v784_v3, %s2077_s28  ;;  %v686_v6 = vld [vmem:[%s2258_s5 + $0x38] sm:$0xf] }
  0xcd   : > { %823 = vrot.lane.b32.xlu0 %v783_v4, %s2077_s28 }
  0xce   : > { %v1016_v9 = vpop.permute.xlu1 %1015 }
  0xcf   : > { %v1014_v10 = vpop.permute.xlu0 %1013  ;;  %1063 = vst.msk [vmem:[#allocation2 + $0x4] sm:$0xf] %vm1061_vm9, %v1016_v9  ;;  %v788_v9 = vld [vmem:[%s2278_s22 + $0x34] sm:$0xf] }
  0xd0   : > { %1062 = vst.msk [vmem:[#allocation2] sm:$0xf] %vm1061_vm9, %v1014_v10  ;;  %829 = vrot.lane.b32.xlu1 %v786_v7, %s2077_s28  ;;  %v787_v10 = vld [vmem:[%s2278_s22 + $0x30] sm:$0xf] }
  0xd1   : > { %827 = vrot.lane.b32.xlu0 %v785_v8, %s2077_s28 }
  0xd2   : > { %v303_v13 = vpop.permute.xlu1 %302 }
  0xd3   : > { %v301_v14 = vpop.permute.xlu0 %300  ;;  %346 = vst.msk [vmem:[#allocation2 + $0x14] sm:$0xf] %vm340_vm2, %v303_v13  ;;  %v790_v13 = vld [vmem:[%s2278_s22 + $0x3c] sm:$0xf] }
  0xd4   : > { %345 = vst.msk [vmem:[#allocation2 + $0x10] sm:$0xf] %vm340_vm2, %v301_v14  ;;  %928 = vrot.lane.b32.xlu1 %v887_v11, %s2078_s20  ;;  %v789_v14 = vld [vmem:[%s2278_s22 + $0x38] sm:$0xf]  ;;  %s1630_s22 = sshll.u32 %s2679_s0, 6 }
  0xd5   : > { %926 = vrot.lane.b32.xlu0 %v886_v12, %s2078_s20  ;;  %s2692_s27 = scalar_lea.vmem [#allocation3], %s1630_s22 }
  0xd6   : > { %v1020_v19 = vpop.permute.xlu1 %1019  ;;  %s1482_s5 = sshll.u32 %s2692_s27, 4  ;;  %s2752_s5 = int_to_ptr.vmem [resolvable:$true] %s1482_s5 }
  0xd7   : > { %v1018_v20 = vpop.permute.xlu0 %1017  ;;  %v1938_v21 = vld [vmem:[#allocation2] sm:$0xff]   ;;  %1065 = vst.msk [vmem:[#allocation2 + $0xc] sm:$0xf] %vm1061_vm9, %v1020_v19 }
  0xd8   : > { %1064 = vst.msk [vmem:[#allocation2 + $0x8] sm:$0xf] %vm1061_vm9, %v1018_v20  ;;  %932 = vrot.lane.b32.xlu1 %v889_v17, %s2078_s20  ;;  %1812 = vmatprep.mubr.bf16.mxu0 %v1938_v21  ;;  %v891_v17 = vld [vmem:[%s2295_s9 + $0x34] sm:$0xf]  ;;  %v893_v21 = vld [vmem:[%s2295_s9 + $0x3c] sm:$0xf] }
  0xd9   : > { %930 = vrot.lane.b32.xlu0 %v888_v18, %s2078_s20  ;;  %v890_v18 = vld [vmem:[%s2295_s9 + $0x30] sm:$0xf] }
  0xda   : > { %v307_v24 = vpop.permute.xlu1 %306 }
  0xdb   : > { %v305_v25 = vpop.permute.xlu0 %304  ;;  %348 = vst.msk [vmem:[#allocation2 + $0x1c] sm:$0xf] %vm340_vm2, %v307_v24 }
  0xdc   : > { %347 = vst.msk [vmem:[#allocation2 + $0x18] sm:$0xf] %vm340_vm2, %v305_v25  ;;  %1031 = vrot.lane.b32.xlu1 %v990_v22, %s2079_s23  ;;  %v892_v22 = vld [vmem:[%s2295_s9 + $0x38] sm:$0xf] }
  0xdd   : > { %1029 = vrot.lane.b32.xlu0 %v989_v23, %s2079_s23 }
  0xde   : > { %v406_v30 = vpop.permute.xlu1 %405 }
  0xdf   : > { %v404_v31 = vpop.permute.xlu0 %403  ;;  %v1940_v32 = vld [vmem:[#allocation2 + $0x8] sm:$0xff]   ;;  %449 = vst.msk [vmem:[#allocation2 + $0x14] sm:$0xf] %vm443_vm3, %v406_v30  ;;  %v996_v30 = vld [vmem:[%s2317_s8 + $0x3c] sm:$0xf] }
  0xe0   : > { %448 = vst.msk [vmem:[#allocation2 + $0x10] sm:$0xf] %vm443_vm3, %v404_v31  ;;  %318 = vrot.lane.b32.xlu1 %v273_v28, %s2900_s4  ;;  %1813 = vmatmul.mubr.bf16.vlgmr.msra.gmra.mxu0 %v1940_v32  ;;  %v995_v31 = vld [vmem:[%s2317_s8 + $0x38] sm:$0xf]  ;;  %s1462_s8 = scalar_lea.sflag [#allocation4], %s2679_s0 }
  0xe1   : > { %316 = vrot.lane.b32.xlu0 %v272_v29, %s2900_s4 }
  0xe2   : > { %v410_v35 = vpop.permute.xlu1 %409 }
  0xe3   : > { %v408_v36 = vpop.permute.xlu0 %407  ;;  %451 = vst.msk [vmem:[#allocation2 + $0x1c] sm:$0xf] %vm443_vm3, %v410_v35 }
  0xe4   : > { %450 = vst.msk [vmem:[#allocation2 + $0x18] sm:$0xf] %vm443_vm3, %v408_v36  ;;  %1035 = vrot.lane.b32.xlu1 %v992_v33, %s2079_s23 }
  0xe5   : > { %1033 = vrot.lane.b32.xlu0 %v991_v34, %s2079_s23 }
  0xe6   : > { %v509_v39 = vpop.permute.xlu1 %508 }
  0xe7   : > { %v507_v40 = vpop.permute.xlu0 %506  ;;  %552 = vst.msk [vmem:[#allocation2 + $0x14] sm:$0xf] %vm546_vm4, %v509_v39 }
  0xe8   : > { %551 = vst.msk [vmem:[#allocation2 + $0x10] sm:$0xf] %vm546_vm4, %v507_v40  ;;  %322 = vrot.lane.b32.xlu1 %v275_v37, %s2900_s4 }
  0xe9   : > { %320 = vrot.lane.b32.xlu0 %v274_v38, %s2900_s4 }
  0xea   : > { %v513_v43 = vpop.permute.xlu1 %512 }
  0xeb   : > { %v511_v44 = vpop.permute.xlu0 %510  ;;  %554 = vst.msk [vmem:[#allocation2 + $0x1c] sm:$0xf] %vm546_vm4, %v513_v43 }
  0xec   : > { %553 = vst.msk [vmem:[#allocation2 + $0x18] sm:$0xf] %vm546_vm4, %v511_v44  ;;  %421 = vrot.lane.b32.xlu1 %v376_v41, %s2901_s24 }
  0xed   : > { %419 = vrot.lane.b32.xlu0 %v375_v42, %s2901_s24 }
  0xee   : > { %v612_v47 = vpop.permute.xlu1 %611 }
  0xef   : > { %v610_v48 = vpop.permute.xlu0 %609  ;;  %655 = vst.msk [vmem:[#allocation2 + $0x14] sm:$0xf] %vm649_vm5, %v612_v47 }
  0xf0   : > { %654 = vst.msk [vmem:[#allocation2 + $0x10] sm:$0xf] %vm649_vm5, %v610_v48  ;;  %425 = vrot.lane.b32.xlu1 %v378_v45, %s2901_s24 }
  0xf1   : > { %423 = vrot.lane.b32.xlu0 %v377_v46, %s2901_s24  ;;  %s1951_s24 = sshll.u32 %s2080_s21, 4  ;;  %s1952_s24 = int_to_ptr.vmem [resolvable:$false] %s1951_s24 }
  0xf2   : > { %v616_v51 = vpop.permute.xlu1 %615  ;;  %p1954_p2 = scmp.lt.s32.totalorder %s2752_s5, %s1952_s24 }
  0xf3   : > { %v614_v52 = vpop.permute.xlu0 %613  ;;  %657 = vst.msk [vmem:[#allocation2 + $0x1c] sm:$0xf] %vm649_vm5, %v616_v51 }
  0xf4   : > { %656 = vst.msk [vmem:[#allocation2 + $0x18] sm:$0xf] %vm649_vm5, %v614_v52  ;;  %524 = vrot.lane.b32.xlu1 %v479_v49, %s2902_s18 }
  0xf5   : > { %522 = vrot.lane.b32.xlu0 %v478_v50, %s2902_s18 }
  0xf6   : > { %v715_v55 = vpop.permute.xlu1 %714 }
  0xf7   : > { %v713_v56 = vpop.permute.xlu0 %712  ;;  %758 = vst.msk [vmem:[#allocation2 + $0x14] sm:$0xf] %vm752_vm6, %v715_v55 }
  0xf8   : > { %757 = vst.msk [vmem:[#allocation2 + $0x10] sm:$0xf] %vm752_vm6, %v713_v56  ;;  %528 = vrot.lane.b32.xlu1 %v481_v53, %s2902_s18 }
  0xf9   : > { %526 = vrot.lane.b32.xlu0 %v480_v54, %s2902_s18  ;;  %s1953_s18 = scalar_lea.vmem %s1952_s24, 2048 }
  0xfa   : > { %v719_v59 = vpop.permute.xlu1 %718 }
  0xfb   : > { %v717_v60 = vpop.permute.xlu0 %716  ;;  %760 = vst.msk [vmem:[#allocation2 + $0x1c] sm:$0xf] %vm752_vm6, %v719_v59 }
  0xfc   : > { %759 = vst.msk [vmem:[#allocation2 + $0x18] sm:$0xf] %vm752_vm6, %v717_v60  ;;  %627 = vrot.lane.b32.xlu1 %v582_v57, %s2903_s29 }
  0xfd   : > { %625 = vrot.lane.b32.xlu0 %v581_v58, %s2903_s29 }
  0xfe   : > { %v818_v63 = vpop.permute.xlu1 %817 }
  0xff   : > { %v816_v0 = vpop.permute.xlu0 %815  ;;  %861 = vst.msk [vmem:[#allocation2 + $0x14] sm:$0xf] %vm855_vm7, %v818_v63 }
 0x100   : > { %860 = vst.msk [vmem:[#allocation2 + $0x10] sm:$0xf] %vm855_vm7, %v816_v0  ;;  %631 = vrot.lane.b32.xlu1 %v584_v61, %s2903_s29 }
 0x101   : > { %629 = vrot.lane.b32.xlu0 %v583_v62, %s2903_s29 }
 0x102   : > { %v822_v3 = vpop.permute.xlu1 %821 }
 0x103   : > { %v820_v4 = vpop.permute.xlu0 %819  ;;  %863 = vst.msk [vmem:[#allocation2 + $0x1c] sm:$0xf] %vm855_vm7, %v822_v3 }
 0x104   : > { %862 = vst.msk [vmem:[#allocation2 + $0x18] sm:$0xf] %vm855_vm7, %v820_v4  ;;  %730 = vrot.lane.b32.xlu1 %v685_v1, %s2076_s10 }
 0x105   : > { %728 = vrot.lane.b32.xlu0 %v684_v2, %s2076_s10 }
 0x106   : > { %v921_v7 = vpop.permute.xlu1 %920 }
 0x107   : > { %v919_v8 = vpop.permute.xlu0 %918  ;;  %964 = vst.msk [vmem:[#allocation2 + $0x14] sm:$0xf] %vm958_vm8, %v921_v7 }
 0x108   : > { %963 = vst.msk [vmem:[#allocation2 + $0x10] sm:$0xf] %vm958_vm8, %v919_v8  ;;  %734 = vrot.lane.b32.xlu1 %v687_v5, %s2076_s10 }
 0x109   : > { %732 = vrot.lane.b32.xlu0 %v686_v6, %s2076_s10  ;;  %s1688_s10 = sshll.u32 %s1479_s7, 6 }
 0x10a   : > { %v925_v11 = vpop.permute.xlu1 %924 }
 0x10b   : > { %v923_v12 = vpop.permute.xlu0 %922  ;;  %966 = vst.msk [vmem:[#allocation2 + $0x1c] sm:$0xf] %vm958_vm8, %v925_v11 }
 0x10c   : > { %965 = vst.msk [vmem:[#allocation2 + $0x18] sm:$0xf] %vm958_vm8, %v923_v12  ;;  %833 = vrot.lane.b32.xlu1 %v788_v9, %s2077_s28 }
 0x10d   : > { %831 = vrot.lane.b32.xlu0 %v787_v10, %s2077_s28 }
 0x10e   : > { %v1024_v15 = vpop.permute.xlu1 %1023 }
 0x10f   : > { %v1022_v16 = vpop.permute.xlu0 %1021  ;;  %1067 = vst.msk [vmem:[#allocation2 + $0x14] sm:$0xf] %vm1061_vm9, %v1024_v15 }
 0x110   : > { %1066 = vst.msk [vmem:[#allocation2 + $0x10] sm:$0xf] %vm1061_vm9, %v1022_v16  ;;  %837 = vrot.lane.b32.xlu1 %v790_v13, %s2077_s28 }
 0x111   : > { %835 = vrot.lane.b32.xlu0 %v789_v14, %s2077_s28 }
 0x112   : > { %v311_v19 = vpop.permute.xlu1 %310 }
 0x113   : > { %v309_v20 = vpop.permute.xlu0 %308  ;;  %350 = vst.msk [vmem:[#allocation2 + $0x24] sm:$0xf] %vm340_vm2, %v311_v19 }
 0x114   : > { %349 = vst.msk [vmem:[#allocation2 + $0x20] sm:$0xf] %vm340_vm2, %v309_v20  ;;  %936 = vrot.lane.b32.xlu1 %v891_v17, %s2078_s20 }
 0x115   : > { %934 = vrot.lane.b32.xlu0 %v890_v18, %s2078_s20 }
 0x116   : > { %v1028_v23 = vpop.permute.xlu1 %1027 }
 0x117   : > { %v1026_v24 = vpop.permute.xlu0 %1025  ;;  %v1941_v25 = vld [vmem:[#allocation2 + $0x10] sm:$0xff]   ;;  %1069 = vst.msk [vmem:[#allocation2 + $0x1c] sm:$0xf] %vm1061_vm9, %v1028_v23 }
 0x118   : > { %1068 = vst.msk [vmem:[#allocation2 + $0x18] sm:$0xf] %vm1061_vm9, %v1026_v24  ;;  %940 = vrot.lane.b32.xlu1 %v893_v21, %s2078_s20  ;;  %1816 = vmatprep.mubr.bf16.mxu0 %v1941_v25 }
 0x119   : > { %938 = vrot.lane.b32.xlu0 %v892_v22, %s2078_s20  ;;  %s2761_s20 = scalar_lea.hbm %s2880_s2, %s1688_s10 }
 0x11a   : > { %v315_v28 = vpop.permute.xlu1 %314 }
 0x11b   : > { %v313_v29 = vpop.permute.xlu0 %312  ;;  %352 = vst.msk [vmem:[#allocation2 + $0x2c] sm:$0xf] %vm340_vm2, %v315_v28 }
 0x11c   : > { %351 = vst.msk [vmem:[#allocation2 + $0x28] sm:$0xf] %vm340_vm2, %v313_v29  ;;  %1039 = vrot.lane.b32.xlu1 %v994_v26, %s2079_s23 }
 0x11d   : > { %1037 = vrot.lane.b32.xlu0 %v993_v27, %s2079_s23 }
 0x11e   : > { %v414_v32 = vpop.permute.xlu1 %413 }
 0x11f   : > { %v412_v33 = vpop.permute.xlu0 %411  ;;  %v1942_v34 = vld [vmem:[#allocation2 + $0x18] sm:$0xff]   ;;  %453 = vst.msk [vmem:[#allocation2 + $0x24] sm:$0xf] %vm443_vm3, %v414_v32 }
 0x120   : > { %452 = vst.msk [vmem:[#allocation2 + $0x20] sm:$0xf] %vm443_vm3, %v412_v33  ;;  %1043 = vrot.lane.b32.xlu1 %v996_v30, %s2079_s23  ;;  %1817 = vmatmul.mubr.bf16.gmra.mxu0 %v1942_v34 }
 0x121   : > { %1041 = vrot.lane.b32.xlu0 %v995_v31, %s2079_s23  ;;  %s1947_s23 = scalar_lea.vmem %s2752_s5, 1024 }
 0x122   : > { %v418_v35 = vpop.permute.xlu1 %417  ;;  %p1948_p13 = scmp.ne.s32.totalorder %s2752_s5, %s1947_s23  ;;  %p1955_p4 = scmp.lt.s32.totalorder %s1953_s18, %s1947_s23 }
 0x123   : > { %v416_v36 = vpop.permute.xlu0 %415  ;;  %455 = vst.msk [vmem:[#allocation2 + $0x2c] sm:$0xf] %vm443_vm3, %v418_v35 }
 0x124   : > { %454 = vst.msk [vmem:[#allocation2 + $0x28] sm:$0xf] %vm443_vm3, %v416_v36  ;;  %p1949_p0 = pnand %p1948_p13, %p2154_p3  ;;  %p1956_p5 = por %p1955_p4, %p1954_p2 }
 0x126   : > { %v517_v37 = vpop.permute.xlu1 %516  ;;  %p1950_p1 = pneg %p1949_p0 }
 0x127   : > { %v515_v38 = vpop.permute.xlu0 %514  ;;  %556 = vst.msk [vmem:[#allocation2 + $0x24] sm:$0xf] %vm546_vm4, %v517_v37 }
 0x128   : > { %555 = vst.msk [vmem:[#allocation2 + $0x20] sm:$0xf] %vm546_vm4, %v515_v38  ;;  %p1957_p6 = pnand %p1956_p5, %p1950_p1 }
 0x12a   : > { %v521_v39 = vpop.permute.xlu1 %520 }
 0x12b   : > { %v519_v40 = vpop.permute.xlu0 %518  ;;  %558 = vst.msk [vmem:[#allocation2 + $0x2c] sm:$0xf] %vm546_vm4, %v521_v39 }
 0x12c   : > { %557 = vst.msk [vmem:[#allocation2 + $0x28] sm:$0xf] %vm546_vm4, %v519_v40 }
 0x12e   : > { %v620_v41 = vpop.permute.xlu1 %619 }
 0x12f   : > { %v618_v42 = vpop.permute.xlu0 %617  ;;  %659 = vst.msk [vmem:[#allocation2 + $0x24] sm:$0xf] %vm649_vm5, %v620_v41 }
 0x130   : > { %658 = vst.msk [vmem:[#allocation2 + $0x20] sm:$0xf] %vm649_vm5, %v618_v42 }
 0x132   : > { %v624_v43 = vpop.permute.xlu1 %623 }
 0x133   : > { %v622_v44 = vpop.permute.xlu0 %621  ;;  %661 = vst.msk [vmem:[#allocation2 + $0x2c] sm:$0xf] %vm649_vm5, %v624_v43 }
 0x134   : > { %660 = vst.msk [vmem:[#allocation2 + $0x28] sm:$0xf] %vm649_vm5, %v622_v44 }
 0x136   : > { %v723_v45 = vpop.permute.xlu1 %722 }
 0x137   : > { %v721_v46 = vpop.permute.xlu0 %720  ;;  %762 = vst.msk [vmem:[#allocation2 + $0x24] sm:$0xf] %vm752_vm6, %v723_v45 }
 0x138   : > { %761 = vst.msk [vmem:[#allocation2 + $0x20] sm:$0xf] %vm752_vm6, %v721_v46 }
 0x13a   : > { %v727_v47 = vpop.permute.xlu1 %726 }
 0x13b   : > { %v725_v48 = vpop.permute.xlu0 %724  ;;  %764 = vst.msk [vmem:[#allocation2 + $0x2c] sm:$0xf] %vm752_vm6, %v727_v47 }
 0x13c   : > { %763 = vst.msk [vmem:[#allocation2 + $0x28] sm:$0xf] %vm752_vm6, %v725_v48 }
 0x13e   : > { %v826_v49 = vpop.permute.xlu1 %825 }
 0x13f   : > { %v824_v50 = vpop.permute.xlu0 %823  ;;  %865 = vst.msk [vmem:[#allocation2 + $0x24] sm:$0xf] %vm855_vm7, %v826_v49 }
 0x140   : > { %864 = vst.msk [vmem:[#allocation2 + $0x20] sm:$0xf] %vm855_vm7, %v824_v50 }
 0x142   : > { %v830_v51 = vpop.permute.xlu1 %829 }
 0x143   : > { %v828_v52 = vpop.permute.xlu0 %827  ;;  %867 = vst.msk [vmem:[#allocation2 + $0x2c] sm:$0xf] %vm855_vm7, %v830_v51 }
 0x144   : > { %866 = vst.msk [vmem:[#allocation2 + $0x28] sm:$0xf] %vm855_vm7, %v828_v52 }
 0x146   : > { %v929_v53 = vpop.permute.xlu1 %928 }
 0x147   : > { %v927_v54 = vpop.permute.xlu0 %926  ;;  %968 = vst.msk [vmem:[#allocation2 + $0x24] sm:$0xf] %vm958_vm8, %v929_v53 }
 0x148   : > { %967 = vst.msk [vmem:[#allocation2 + $0x20] sm:$0xf] %vm958_vm8, %v927_v54 }
 0x14a   : > { %v933_v55 = vpop.permute.xlu1 %932 }
 0x14b   : > { %v931_v56 = vpop.permute.xlu0 %930  ;;  %970 = vst.msk [vmem:[#allocation2 + $0x2c] sm:$0xf] %vm958_vm8, %v933_v55 }
 0x14c   : > { %969 = vst.msk [vmem:[#allocation2 + $0x28] sm:$0xf] %vm958_vm8, %v931_v56 }
 0x14e   : > { %v1032_v57 = vpop.permute.xlu1 %1031 }
 0x14f   : > { %v1030_v58 = vpop.permute.xlu0 %1029  ;;  %1071 = vst.msk [vmem:[#allocation2 + $0x24] sm:$0xf] %vm1061_vm9, %v1032_v57 }
 0x150   : > { %1070 = vst.msk [vmem:[#allocation2 + $0x20] sm:$0xf] %vm1061_vm9, %v1030_v58 }
 0x152   : > { %v319_v59 = vpop.permute.xlu1 %318 }
 0x153   : > { %v317_v60 = vpop.permute.xlu0 %316  ;;  %354 = vst.msk [vmem:[#allocation2 + $0x34] sm:$0xf] %vm340_vm2, %v319_v59 }
 0x154   : > { %353 = vst.msk [vmem:[#allocation2 + $0x30] sm:$0xf] %vm340_vm2, %v317_v60 }
 0x156   : > { %v1036_v61 = vpop.permute.xlu1 %1035 }
 0x157   : > { %v1034_v62 = vpop.permute.xlu0 %1033  ;;  %v1943_v63 = vld [vmem:[#allocation2 + $0x20] sm:$0xff]   ;;  %1073 = vst.msk [vmem:[#allocation2 + $0x2c] sm:$0xf] %vm1061_vm9, %v1036_v61 }
 0x158   : > { %1072 = vst.msk [vmem:[#allocation2 + $0x28] sm:$0xf] %vm1061_vm9, %v1034_v62  ;;  %1820 = vmatprep.mubr.bf16.mxu1 %v1943_v63 }
 0x15a   : > { %v323_v0 = vpop.permute.xlu1 %322 }
 0x15b   : > { %v321_v1 = vpop.permute.xlu0 %320  ;;  %356 = vst.msk [vmem:[#allocation2 + $0x3c] sm:$0xf] %vm340_vm2, %v323_v0 }
 0x15c   : > { %355 = vst.msk [vmem:[#allocation2 + $0x38] sm:$0xf] %vm340_vm2, %v321_v1 }
 0x15e   : > { %v422_v2 = vpop.permute.xlu1 %421 }
 0x15f   : > { %v420_v3 = vpop.permute.xlu0 %419  ;;  %v1944_v4 = vld [vmem:[#allocation2 + $0x28] sm:$0xff]   ;;  %457 = vst.msk [vmem:[#allocation2 + $0x34] sm:$0xf] %vm443_vm3, %v422_v2 }
 0x160   : > { %456 = vst.msk [vmem:[#allocation2 + $0x30] sm:$0xf] %vm443_vm3, %v420_v3  ;;  %1821 = vmatmul.mubr.bf16.vlgmr.msra.gmra.mxu1 %v1944_v4 }
 0x162   : > { %v426_v5 = vpop.permute.xlu1 %425 }
 0x163   : > { %v424_v6 = vpop.permute.xlu0 %423  ;;  %459 = vst.msk [vmem:[#allocation2 + $0x3c] sm:$0xf] %vm443_vm3, %v426_v5 }
 0x164   : > { %458 = vst.msk [vmem:[#allocation2 + $0x38] sm:$0xf] %vm443_vm3, %v424_v6 }
 0x166   : > { %v525_v7 = vpop.permute.xlu1 %524 }
 0x167   : > { %v523_v8 = vpop.permute.xlu0 %522  ;;  %560 = vst.msk [vmem:[#allocation2 + $0x34] sm:$0xf] %vm546_vm4, %v525_v7 }
 0x168   : > { %559 = vst.msk [vmem:[#allocation2 + $0x30] sm:$0xf] %vm546_vm4, %v523_v8 }
 0x16a   : > { %v529_v9 = vpop.permute.xlu1 %528 }
 0x16b   : > { %v527_v10 = vpop.permute.xlu0 %526  ;;  %562 = vst.msk [vmem:[#allocation2 + $0x3c] sm:$0xf] %vm546_vm4, %v529_v9 }
 0x16c   : > { %561 = vst.msk [vmem:[#allocation2 + $0x38] sm:$0xf] %vm546_vm4, %v527_v10 }
 0x16e   : > { %v628_v11 = vpop.permute.xlu1 %627 }
 0x16f   : > { %v626_v12 = vpop.permute.xlu0 %625  ;;  %663 = vst.msk [vmem:[#allocation2 + $0x34] sm:$0xf] %vm649_vm5, %v628_v11 }
 0x170   : > { %662 = vst.msk [vmem:[#allocation2 + $0x30] sm:$0xf] %vm649_vm5, %v626_v12 }
 0x172   : > { %v632_v13 = vpop.permute.xlu1 %631 }
 0x173   : > { %v630_v14 = vpop.permute.xlu0 %629  ;;  %665 = vst.msk [vmem:[#allocation2 + $0x3c] sm:$0xf] %vm649_vm5, %v632_v13 }
 0x174   : > { %664 = vst.msk [vmem:[#allocation2 + $0x38] sm:$0xf] %vm649_vm5, %v630_v14 }
 0x176   : > { %v731_v15 = vpop.permute.xlu1 %730 }
 0x177   : > { %v729_v16 = vpop.permute.xlu0 %728  ;;  %766 = vst.msk [vmem:[#allocation2 + $0x34] sm:$0xf] %vm752_vm6, %v731_v15 }
 0x178   : > { %765 = vst.msk [vmem:[#allocation2 + $0x30] sm:$0xf] %vm752_vm6, %v729_v16 }
 0x17a   : > { %v735_v17 = vpop.permute.xlu1 %734 }
 0x17b   : > { %v733_v18 = vpop.permute.xlu0 %732  ;;  %768 = vst.msk [vmem:[#allocation2 + $0x3c] sm:$0xf] %vm752_vm6, %v735_v17 }
 0x17c   : > { %767 = vst.msk [vmem:[#allocation2 + $0x38] sm:$0xf] %vm752_vm6, %v733_v18 }
 0x17e   : > { %v834_v19 = vpop.permute.xlu1 %833 }
 0x17f   : > { %v832_v20 = vpop.permute.xlu0 %831  ;;  %869 = vst.msk [vmem:[#allocation2 + $0x34] sm:$0xf] %vm855_vm7, %v834_v19 }
 0x180   : > { %868 = vst.msk [vmem:[#allocation2 + $0x30] sm:$0xf] %vm855_vm7, %v832_v20 }
 0x182   : > { %v838_v21 = vpop.permute.xlu1 %837 }
 0x183   : > { %v836_v22 = vpop.permute.xlu0 %835  ;;  %871 = vst.msk [vmem:[#allocation2 + $0x3c] sm:$0xf] %vm855_vm7, %v838_v21 }
 0x184   : > { %870 = vst.msk [vmem:[#allocation2 + $0x38] sm:$0xf] %vm855_vm7, %v836_v22 }
 0x186   : > { %v937_v23 = vpop.permute.xlu1 %936 }
 0x187   : > { %v935_v24 = vpop.permute.xlu0 %934  ;;  %972 = vst.msk [vmem:[#allocation2 + $0x34] sm:$0xf] %vm958_vm8, %v937_v23 }
 0x188   : > { %971 = vst.msk [vmem:[#allocation2 + $0x30] sm:$0xf] %vm958_vm8, %v935_v24 }
 0x18a   : > { %v941_v25 = vpop.permute.xlu1 %940 }
 0x18b   : > { %v939_v26 = vpop.permute.xlu0 %938  ;;  %974 = vst.msk [vmem:[#allocation2 + $0x3c] sm:$0xf] %vm958_vm8, %v941_v25 }
 0x18c   : > { %973 = vst.msk [vmem:[#allocation2 + $0x38] sm:$0xf] %vm958_vm8, %v939_v26 }
 0x18e   : > { %v1040_v27 = vpop.permute.xlu1 %1039 }
 0x18f   : > { %v1038_v28 = vpop.permute.xlu0 %1037  ;;  %1075 = vst.msk [vmem:[#allocation2 + $0x34] sm:$0xf] %vm1061_vm9, %v1040_v27 }
 0x190   : > { %1074 = vst.msk [vmem:[#allocation2 + $0x30] sm:$0xf] %vm1061_vm9, %v1038_v28 }
 0x192   : > { %v1044_v29 = vpop.permute.xlu1 %1043 }
 0x193   : > { %v1042_v30 = vpop.permute.xlu0 %1041  ;;  %1077 = vst.msk [vmem:[#allocation2 + $0x3c] sm:$0xf] %vm1061_vm9, %v1044_v29 }
 0x194   : > { %1076 = vst.msk [vmem:[#allocation2 + $0x38] sm:$0xf] %vm1061_vm9, %v1042_v30 }
 0x197   : > { %v1945_v31 = vld [vmem:[#allocation2 + $0x30] sm:$0xff]  }
 0x198   : > { %1824 = vmatprep.mubr.bf16.mxu1 %v1945_v31 }
 0x19b   : > { %v1946_v32 = vld [vmem:[#allocation2 + $0x38] sm:$0xff]  }
 0x19c   : > { %1825 = vmatmul.mubr.bf16.gmra.mxu1 %v1946_v32 }
 0x1a0   : > { %v2681_v33 = vpop.f32.mrf.mxu0 }
 0x1a2   : > { %v2684_v34 = vpop.f32.mrf.mxu0 }
 0x1a4   : > { %v2686_v35 = vpop.f32.mrf.mxu0 }
 0x1a5   : > { %v1733_v36 = vpack.c.bf16 %v2686_v35, %v2681_v33 }
 0x1a6   : > { %v2690_v37 = vpop.f32.mrf.mxu0 }
 0x1a7   : > { %1773 = vst [vmem:[%s2692_s27 + $0x8] sm:$0xff] %v1733_v36   ;;  %v1728_v38 = vpack.c.bf16 %v2690_v37, %v2684_v34  ;;  %v1303_v51 = vadd.f32 %v2690_v37, %v2684_v34 }
 0x1a9   : > { %1729 = vst [vmem:[%s2692_s27] sm:$0xff] %v1728_v38   ;;  %v1304_v52 = vadd.f32 %v2681_v33, %v1303_v51 }
 0x1ab   : > { %v1305_v53 = vadd.f32 %v2686_v35, %v1304_v52 }
 0x1e0   : > { %v2698_v39 = vpop.f32.mrf.mxu0 }
 0x1e2   : > { %v2700_v40 = vpop.f32.mrf.mxu0 }
 0x1e3   : > { %v1306_v54 = vadd.f32 %v1305_v53, %v2700_v40 }
 0x1e4   : > { %v2702_v41 = vpop.f32.mrf.mxu0 }
 0x1e5   : > { %v1743_v42 = vpack.c.bf16 %v2702_v41, %v2698_v39 }
 0x1e6   : > { %v2706_v43 = vpop.f32.mrf.mxu0 }
 0x1e7   : > { %1775 = vst [vmem:[%s2692_s27 + $0x18] sm:$0xff] %v1743_v42   ;;  %v1738_v44 = vpack.c.bf16 %v2706_v43, %v2700_v40  ;;  %v1307_v55 = vadd.f32 %v1306_v54, %v2706_v43 }
 0x1e9   : > { %1774 = vst [vmem:[%s2692_s27 + $0x10] sm:$0xff] %v1738_v44   ;;  %v1308_v56 = vadd.f32 %v2698_v39, %v1307_v55 }
 0x1eb   : > { %v1309_v57 = vadd.f32 %v2702_v41, %v1308_v56 }
 0x220   : > { %v2712_v45 = vpop.f32.mrf.mxu1 }
 0x222   : > { %v2714_v46 = vpop.f32.mrf.mxu1 }
 0x223   : > { %v1310_v58 = vadd.f32 %v1309_v57, %v2714_v46 }
 0x224   : > { %v2716_v47 = vpop.f32.mrf.mxu1 }
 0x225   : > { %v1753_v48 = vpack.c.bf16 %v2716_v47, %v2712_v45 }
 0x226   : > { %v2720_v49 = vpop.f32.mrf.mxu1 }
 0x227   : > { %1777 = vst [vmem:[%s2692_s27 + $0x28] sm:$0xff] %v1753_v48   ;;  %v1748_v50 = vpack.c.bf16 %v2720_v49, %v2714_v46  ;;  %v1311_v59 = vadd.f32 %v1310_v58, %v2720_v49 }
 0x229   : > { %1776 = vst [vmem:[%s2692_s27 + $0x20] sm:$0xff] %v1748_v50   ;;  %v1312_v60 = vadd.f32 %v2712_v45, %v1311_v59 }
 0x22b   : > { %v1313_v63 = vadd.f32 %v2716_v47, %v1312_v60 }
 0x25c   : > { %v2739_v61 = vpop.f32.mrf.mxu1 }
 0x25e   : > { %v2741_v62 = vpop.f32.mrf.mxu1 }
 0x25f   : > { %v1314_v1 = vadd.f32 %v1313_v63, %v2741_v62 }
 0x260   : > { %v2745_v0 = vpop.f32.mrf.mxu1 }
 0x261   : > { %v1763_v2 = vpack.c.bf16 %v2745_v0, %v2739_v61 }
 0x262   : > { %v2750_v3 = vpop.f32.mrf.mxu1 }
 0x263   : > { %1779 = vst [vmem:[%s2692_s27 + $0x38] sm:$0xff] %v1763_v2   ;;  %v1315_v4 = vadd.f32 %v1314_v1, %v2750_v3  ;;  %v1758_v5 = vpack.c.bf16 %v2750_v3, %v2741_v62 }
 0x265   : > { %v1316_v6 = vadd.f32 %v2739_v61, %v1315_v4  ;;  %1778 = vst [vmem:[%s2692_s27 + $0x30] sm:$0xff] %v1758_v5  }
 0x266   : > { %1960 = shalt.err (!%p1957_p6)
}
 0x267   : > { %s1961_s29 = scalar_lea.hbm %s2761_s20, 1024  ;;  %s1965_s6 = scalar_lea.hbm %s2880_s2, 4096 }
 0x268   : > { %p1962_p7 = scmp.ne.s32.totalorder %s2761_s20, %s1961_s29  ;;  %p1966_p11 = scmp.lt.s32.totalorder %s2761_s20, %s2880_s2 }
 0x269   : > { %p1967_p12 = scmp.lt.s32.totalorder %s1965_s6, %s1961_s29 }
 0x26a   : > { %p1963_p9 = pnand %p1962_p7, %p2154_p3 }
 0x26b   : > { %p1968_p13 = por %p1967_p12, %p1966_p11 }
 0x26c   : > { %p1964_p10 = pneg %p1963_p9 }
 0x26e   : > { %p1969_p0 = pnand %p1968_p13, %p1964_p10 }
 0x270   : > { %1972 = shalt.err (!%p1969_p0)
}
 0x271   : > { %s2081_s10 = smov 64   ;;  %v1317_v7 = vadd.f32 %v2745_v0, %v1316_v6  ;;  %vm1458_vm10 = vcmask 1040384  }
 0x272   : > { %1845 = dma.vmem_to_hbm [thread:$0]  (%p2154_p3), %s2752_s5, 1024, %s2761_s20, %s1462_s8, %s2081_s10, %s2081_s10, %s2900_s4  }
 0x273   : > { %v1318_v8 = vrot.slane %v1317_v7, 4  ;;  %s1631_s4 = sshll.u32 %s2679_s0, 1  ;;  %s1689_s5 = sshll.u32 %s2057_s16, 1 }
 0x274   : > { %s1496_s28 = sadd.s32 %s2053_s15, %s1689_s5  ;;  %s190_s20 = scalar_lea.vmem [#allocation5], %s1631_s4 }
 0x275   : > { %v1319_v9 = vadd.f32 %v1318_v8, %v1317_v7  ;;  %s1690_s9 = sshll.u32 %s1496_s28, 5  ;;  %s1500_s8 = sshll.u32 %s190_s20, 4  ;;  %s1501_s8 = int_to_ptr.vmem [resolvable:$true] %s1500_s8 }
 0x276   : > { %s2830_s24 = scalar_lea.hbm %s2881_s3, %s1690_s9  ;;  %s1467_s16 = scalar_lea.sflag [#allocation6], %s2679_s0 }
 0x277   : > { %v1320_v10 = vrot.slane %v1319_v9, 2  ;;  %s1973_s18 = scalar_lea.vmem %s1501_s8, 32  ;;  %s2082_s15 = smov [#allocation5]  }
 0x278   : > { %p1974_p1 = scmp.ne.s32.totalorder %s1501_s8, %s1973_s18  ;;  %s1977_s29 = sshll.u32 %s2082_s15, 4  ;;  %s1978_s29 = int_to_ptr.vmem [resolvable:$false] %s1977_s29 }
 0x279   : > { %v1321_v11 = vadd.f32 %v1320_v10, %v1319_v9  ;;  %s1979_s22 = scalar_lea.vmem %s1978_s29, 64  ;;  %p1980_p5 = scmp.lt.s32.totalorder %s1501_s8, %s1978_s29 }
 0x27a   : > { %p1975_p2 = pnand %p1974_p1, %p2154_p3  ;;  %p1981_p6 = scmp.lt.s32.totalorder %s1979_s22, %s1973_s18 }
 0x27b   : > { %v1322_v12 = vrot.slane %v1321_v11, 1 }
 0x27c   : > { %p1976_p4 = pneg %p1975_p2  ;;  %p1982_p7 = por %p1981_p6, %p1980_p5 }
 0x27d   : > { %v1323_v13 = vadd.f32 %v1322_v12, %v1321_v11 }
 0x27e   : > { %p1983_p9 = pnand %p1982_p7, %p1976_p4 }
 0x27f   : > { %v2790_v14 = vmul.f32 0.0078125, %v1323_v13 }
 0x281   : > { %v1325_v15 = vsub.f32 %v2684_v34, %v2790_v14  ;;  %v1326_v16 = vsub.f32 %v2690_v37, %v2790_v14  ;;  %v1327_v17 = vsub.f32 %v2681_v33, %v2790_v14  ;;  %v1328_v20 = vsub.f32 %v2686_v35, %v2790_v14 }
 0x282   : > { %v1329_v21 = vsub.f32 %v2700_v40, %v2790_v14  ;;  %v1330_v24 = vsub.f32 %v2706_v43, %v2790_v14  ;;  %v1331_v27 = vsub.f32 %v2698_v39, %v2790_v14  ;;  %v1332_v30 = vsub.f32 %v2702_v41, %v2790_v14 }
 0x283   : > { %v1341_v18 = vmul.f32 %v1325_v15, %v1325_v15  ;;  %v1342_v19 = vmul.f32 %v1326_v16, %v1326_v16  ;;  %v1343_v22 = vmul.f32 %v1327_v17, %v1327_v17  ;;  %v1344_v25 = vmul.f32 %v1328_v20, %v1328_v20 }
 0x284   : > { %v1345_v28 = vmul.f32 %v1329_v21, %v1329_v21  ;;  %v1346_v31 = vmul.f32 %v1330_v24, %v1330_v24  ;;  %v1333_v33 = vsub.f32 %v2714_v46, %v2790_v14  ;;  %v1347_v34 = vmul.f32 %v1331_v27, %v1331_v27 }
 0x285   : > { %v1357_v23 = vadd.f32 %v1342_v19, %v1341_v18  ;;  %v1334_v36 = vsub.f32 %v2720_v49, %v2790_v14  ;;  %v1348_v37 = vmul.f32 %v1332_v30, %v1332_v30  ;;  %v1335_v39 = vsub.f32 %v2712_v45, %v2790_v14 }
 0x286   : > { %v1349_v40 = vmul.f32 %v1333_v33, %v1333_v33  ;;  %v1336_v41 = vsub.f32 %v2716_v47, %v2790_v14  ;;  %v1337_v46 = vsub.f32 %v2741_v62, %v2790_v14  ;;  %v1338_v49 = vsub.f32 %v2750_v3, %v2790_v14 }
 0x287   : > { %v1358_v26 = vadd.f32 %v1357_v23, %v1343_v22  ;;  %v1350_v43 = vmul.f32 %v1334_v36, %v1334_v36  ;;  %v1351_v48 = vmul.f32 %v1335_v39, %v1335_v39  ;;  %v1339_v45 = vsub.f32 %v2739_v61, %v2790_v14 }
 0x288   : > { %v1352_v51 = vmul.f32 %v1336_v41, %v1336_v41  ;;  %v1353_v53 = vmul.f32 %v1337_v46, %v1337_v46  ;;  %v1340_v54 = vsub.f32 %v2745_v0, %v2790_v14  ;;  %v1354_v55 = vmul.f32 %v1338_v49, %v1338_v49 }
 0x289   : > { %v1359_v29 = vadd.f32 %v1358_v26, %v1344_v25  ;;  %v1355_v57 = vmul.f32 %v1339_v45, %v1339_v45 }
 0x28a   : > { %v1356_v59 = vmul.f32 %v1340_v54, %v1340_v54 }
 0x28b   : > { %v1360_v32 = vadd.f32 %v1359_v29, %v1345_v28 }
 0x28d   : > { %v1361_v35 = vadd.f32 %v1360_v32, %v1346_v31 }
 0x28f   : > { %v1362_v38 = vadd.f32 %v1361_v35, %v1347_v34 }
 0x291   : > { %v1363_v42 = vadd.f32 %v1362_v38, %v1348_v37 }
 0x293   : > { %v1364_v44 = vadd.f32 %v1363_v42, %v1349_v40 }
 0x295   : > { %v1365_v50 = vadd.f32 %v1364_v44, %v1350_v43 }
 0x297   : > { %v1366_v52 = vadd.f32 %v1365_v50, %v1351_v48 }
 0x299   : > { %v1367_v47 = vadd.f32 %v1366_v52, %v1352_v51 }
 0x29b   : > { %v1368_v56 = vadd.f32 %v1367_v47, %v1353_v53 }
 0x29d   : > { %v1369_v58 = vadd.f32 %v1368_v56, %v1354_v55 }
 0x29f   : > { %v1370_v60 = vadd.f32 %v1369_v58, %v1355_v57 }
 0x2a1   : > { %v1371_v62 = vadd.f32 %v1370_v60, %v1356_v59 }
 0x2a3   : > { %v1372_v63 = vrot.slane %v1371_v62, 4 }
 0x2a5   : > { %v1373_v1 = vadd.f32 %v1372_v63, %v1371_v62 }
 0x2a7   : > { %v1374_v2 = vrot.slane %v1373_v1, 2 }
 0x2a9   : > { %v1375_v61 = vadd.f32 %v1374_v2, %v1373_v1 }
 0x2ab   : > { %v1376_v3 = vrot.slane %v1375_v61, 1 }
 0x2ad   : > { %v1377_v0 = vadd.f32 %v1376_v3, %v1375_v61 }
 0x2af   : > { %v1459_v4 = vsel %vm1458_vm10, %v2790_v14, %v1377_v0 }
 0x2b0   : > { %1460 = vst [vmem:[%s190_s20] sm:$0x3] %v1459_v4 }
 0x2b1   : > { %1986 = shalt.err (!%p1983_p9)
}
 0x2b2   : > { %s1987_s27 = scalar_lea.hbm %s2830_s24, 32  ;;  %s1991_s11 = scalar_lea.hbm %s2881_s3, 128 }
 0x2b3   : > { %p1988_p10 = scmp.ne.s32.totalorder %s2830_s24, %s1987_s27  ;;  %p1992_p13 = scmp.lt.s32.totalorder %s2830_s24, %s2881_s3 }
 0x2b4   : > { %p1993_p0 = scmp.lt.s32.totalorder %s1991_s11, %s1987_s27 }
 0x2b5   : > { %p1989_p11 = pnand %p1988_p10, %p2154_p3 }
 0x2b6   : > { %p1994_p1 = por %p1993_p0, %p1992_p13 }
 0x2b7   : > { %p1990_p12 = pneg %p1989_p11 }
 0x2b9   : > { %p1995_p2 = pnand %p1994_p1, %p1990_p12 }
 0x2bb   : > { %1998 = shalt.err (!%p1995_p2)
}
 0x2bc   : > { %1846 = dma.vmem_to_hbm [thread:$0]  (%p2154_p3), %s1501_s8, 32, %s2830_s24, %s1467_s16  }
 0x2bd PF: > { %p1856_p4 = scmp.ge.s32.totalorder %s2069_s19, 2  ;;  %s1512_s4 = sand.u32 1, %s2041_s12  }
 0x2be   : > { %s1513_s5 = scalar_lea.sflag [#allocation4], %s1512_s4 }
 0x2bf   : > { %p1850_p5 = pnand %p1856_p4, %p2163_p8 }
 0x2c1   : > { %p1851_p6 = pneg %p1850_p5 }
 0x2c3   : > { %2032 = dma.done.wait (%p1851_p6), %s1513_s5, 1024  }
 0x2c4   : > { %2034 = vsyncadd (%p1851_p6), %s1513_s5, 4294966272  ;;  %s1522_s28 = scalar_lea.sflag [#allocation6], %s1512_s4 }
 0x2c5   : > { %2036 = dma.done.wait (%p1851_p6), %s1522_s28, 32  }
 0x2c6   : > { %2038 = vsyncadd (%p1851_p6), %s1522_s28, 4294967264  ;;  %s20_s19 = sadd.s32 1, %s2069_s19   ;;  %s2904_s16 = sld [smem:[#allocation9_spill]] }
 0x2c7   : > { %p17_p7 = scmp.ge.s32.totalorder %s20_s19, 6   ;;  %s2905_s25 = sld [smem:[#allocation10_spill]] }
 0x2c8   : > { %s2906_s18 = sld [smem:[#allocation11_spill]]  ;;  %s2907_s12 = smov %s2045_s13 }
 0x2c9   : > { %s2908_s13 = smov %s2049_s14  ;;  %s2909_s14 = smov %s2172_s30 }
 0x2ca   : > { %s2910_s15 = smov %s2061_s17  ;;  %19 = sbr.rel (!%p17_p7) target bundleno = 9 (0x9), region = 89 }
 0x2cd   : > { %s2911_s17 = smov %s2905_s25 }
 0x2cf   :  { %1527 = vsyncpa [#allocation4], 1 }
 0x2d0   :  { %1529 = vsyncpa [#allocation4 + $0x1], 1 }
 0x2d1   :  { %1530 = vsyncpa [#allocation6], 1 }
 0x2d2   :  { %1532 = vsyncpa [#allocation6 + $0x1], 1 }

</bundles_post_ra>
